<compile_context>
chip_gen: v5e
topology: v5e:2x2
jax: 0.10.0
libtpu: 0.0.40
codegen_flags: <defaults>
</compile_context>

<pallas_src>
import functools
import math

import jax
import jax.numpy as jnp
from jax import lax
from jax.experimental import pallas as pl
from jax.experimental.pallas import tpu as pltpu

SIGMA = 1.0
KSIZE = 5
WEAK_PIXEL = 75.0
STRONG_PIXEL = 255.0
LOW_THRESHOLD = 0.00392
HIGH_THRESHOLD = 0.15
TAN_22_5 = math.sqrt(2.0) - 1.0  # tan(22.5 deg): octant boundary


def _gaussian_window(k, std):
    # scipy.signal.gaussian(k, std): NOT normalized (peak == 1), exactly as the reference.
    half = (k - 1) / 2.0
    return [math.exp(-0.5 * ((i - half) / std) ** 2) for i in range(k)]


def _round_up(x, m):
    return ((x + m - 1) // m) * m


def _shift(x, d, axis):
    """y[p] = x[p + d] along `axis` (circular roll on the padded tile).

    Exact zero-padding semantics follow from >=2 zero rows/cols of padding plus the
    callers keeping the pad region zero before each stage, so wrapped elements only ever
    read (or land in) zero padding / the pad region.
    """
    if d == 0:
        return x
    n = x.shape[axis]
    return pltpu.roll(x, shift=(-d) % n, axis=axis)


def _conv1d(x, taps, axis):
    """Zero-padded 1-D cross-correlation: y[p] = sum_d w_d * x[p + d] (VPU/XLU only)."""
    acc = None
    for d, w in taps:
        if w == 0.0:
            continue
        t = _shift(x, d, axis)
        term = t if w == 1.0 else t * jnp.float32(w)
        acc = term if acc is None else acc + term
    return acc


def _canny_thin_kernel(x_ref, thin_ref, mx_ref, *, H, W):
    """Gaussian smoothing + Sobel + normalized |grad| + non-max suppression (one image)."""
    _, Hp, Wp = x_ref.shape
    x = x_ref[0]

    row = lax.broadcasted_iota(jnp.int32, (Hp, Wp), 0)
    col = lax.broadcasted_iota(jnp.int32, (Hp, Wp), 1)
    vmask = jnp.logical_and(row < H, col < W)   # true image region inside the padded tile

    # --- noise removal: separable 1x5 / 5x1 gaussian, zero padding --------------------
    g = _gaussian_window(KSIZE, SIGMA)
    gtaps = [(k - KSIZE // 2, g[k]) for k in range(KSIZE)]
    sm = _conv1d(x, gtaps, axis=1)              # horizontal
    sm = _conv1d(sm, gtaps, axis=0)             # vertical
    sm = jnp.where(vmask, sm, 0.0)              # keep zero-padding semantics at the border

    # --- sobel gradients (cross-correlation, padding 1), separable --------------------
    diff = [(-1, 1.0), (1, -1.0)]               # [1, 0, -1]
    smooth3 = [(-1, 1.0), (0, 2.0), (1, 1.0)]   # [1, 2, 1]
    Ix = _conv1d(_conv1d(sm, diff, axis=1), smooth3, axis=0)
    Iy = _conv1d(_conv1d(sm, smooth3, axis=1), diff, axis=0)

    gm = jnp.sqrt(Ix * Ix + Iy * Iy)
    gm = jnp.where(vmask, gm, 0.0)
    gm = gm / jnp.max(gm)                       # per-image normalization (0/0 -> nan, as torch)

    # --- 8 zero-padded neighbour values of |grad| --------------------------------------
    g_dn = _shift(gm, +1, 0)                    # (+1, 0)
    g_up = _shift(gm, -1, 0)                    # (-1, 0)
    sh0 = _shift(gm, +1, 1)                     # ( 0,+1)
    sh4 = _shift(gm, -1, 1)                     # ( 0,-1)
    sh1 = _shift(g_dn, +1, 1)                   # (+1,+1)
    sh3 = _shift(g_dn, -1, 1)                   # (+1,-1)
    sh7 = _shift(g_up, +1, 1)                   # (-1,+1)
    sh5 = _shift(g_up, -1, 1)                   # (-1,-1)

    # --- direction quantization (equivalent to round(atan2-angle / 45) % 8) ------------
    # Only max(pos_nb, neg_nb) is needed since min(gm-a, gm-b) > 0  <=>  gm > max(a, b),
    # and the (pos, neg) neighbours always form an opposite pair.
    ax_ = jnp.abs(Ix)
    ay_ = jnp.abs(Iy)
    cond_h = ay_ <= TAN_22_5 * ax_              # within +-22.5 deg of the horizontal axis
    cond_v = ax_ <= TAN_22_5 * ay_              # within +-22.5 deg of the vertical axis
    same_sign = (Iy > 0.0) == (Ix > 0.0)        # selects the (+1,+1)/(-1,-1) diagonal

    nb = jnp.where(cond_h, jnp.maximum(sh0, sh4),
         jnp.where(cond_v, jnp.maximum(g_dn, g_up),
         jnp.where(same_sign, jnp.maximum(sh1, sh5), jnp.maximum(sh3, sh7))))

    thin = jnp.where(gm > nb, gm, 0.0)
    thin_ref[0] = thin
    # per-image max broadcast over one aligned tile (feeds the global high threshold)
    mx_ref[...] = jnp.full((1, 8, 128), jnp.max(thin), dtype=jnp.float32)


def _edges_from_thin(thin, hi, vmask):
    """Double threshold + hysteresis (reference semantics) on one padded thin-edge map."""
    strong = jnp.logical_and(thin >= hi, vmask)
    weak = jnp.logical_and(thin < hi, thin >= jnp.float32(LOW_THRESHOLD))
    inter = jnp.where(strong, jnp.float32(STRONG_PIXEL),
            jnp.where(weak, jnp.float32(WEAK_PIXEL), jnp.float32(0.0)))

    def neighbour_has_strong(cur):
        s = jnp.where(cur == STRONG_PIXEL, 1.0, 0.0).astype(jnp.float32)
        # separable 3x3 max with zero padding; the centre is included, which is harmless
        # because the result is only consulted at weak pixels (centre == 0 there).
        h = jnp.maximum(s, jnp.maximum(_shift(s, +1, 1), _shift(s, -1, 1)))
        v = jnp.maximum(h, jnp.maximum(_shift(h, +1, 0), _shift(h, -1, 0)))
        return v > 0.0

    def cond(carry):
        return carry[1] > 0.0

    def body(carry):
        cur, _ = carry
        new_strong = jnp.logical_and(cur == WEAK_PIXEL, neighbour_has_strong(cur))
        cur = jnp.where(new_strong, jnp.float32(STRONG_PIXEL), cur)
        changed = jnp.max(new_strong.astype(jnp.float32))
        return cur, changed

    final, _ = lax.while_loop(cond, body, (inter, jnp.float32(1.0)))
    return jnp.where(final == STRONG_PIXEL, jnp.float32(STRONG_PIXEL), jnp.float32(0.0))


def _hyst_pair_sse_kernel(hi_ref, p_ref, t_ref, sse_ref, *, H, W):
    """Fused pred+target hysteresis and squared-difference reduction for one image.

    hi_ref: SMEM (2,) = [pred high threshold, target high threshold].
    Writes per-image sum((target_edges - pred_edges)^2) into an aligned (1,8,128) tile.
    Edge maps never leave VMEM/vregs.
    """
    _, Hp, Wp = p_ref.shape
    row = lax.broadcasted_iota(jnp.int32, (Hp, Wp), 0)
    col = lax.broadcasted_iota(jnp.int32, (Hp, Wp), 1)
    vmask = jnp.logical_and(row < H, col < W)

    pred_edges = _edges_from_thin(p_ref[0], hi_ref[0], vmask)
    targ_edges = _edges_from_thin(t_ref[0], hi_ref[1], vmask)

    d = targ_edges - pred_edges                 # pad region is 0 in both maps
    sse_ref[...] = jnp.full((1, 8, 128), jnp.sum(d * d), dtype=jnp.float32)


def _canny_thin(x_pad, H, W):
    B, Hp, Wp = x_pad.shape
    kernel = functools.partial(_canny_thin_kernel, H=H, W=W)
    return pl.pallas_call(
        kernel,
        out_shape=(jax.ShapeDtypeStruct((B, Hp, Wp), jnp.float32),
                   jax.ShapeDtypeStruct((B, 8, 128), jnp.float32)),
        grid=(B,),
        in_specs=[pl.BlockSpec((1, Hp, Wp), lambda b: (b, 0, 0))],
        out_specs=(pl.BlockSpec((1, Hp, Wp), lambda b: (b, 0, 0)),
                   pl.BlockSpec((1, 8, 128), lambda b: (b, 0, 0))),
        compiler_params=pltpu.CompilerParams(dimension_semantics=("parallel",)),
    )(x_pad)


def _hysteresis_pair_sse(p_thin, t_thin, hi, H, W):
    B, Hp, Wp = p_thin.shape
    kernel = functools.partial(_hyst_pair_sse_kernel, H=H, W=W)
    return pl.pallas_call(
        kernel,
        out_shape=jax.ShapeDtypeStruct((B, 8, 128), jnp.float32),
        grid=(B,),
        in_specs=[pl.BlockSpec(memory_space=pltpu.MemorySpace.SMEM),
                  pl.BlockSpec((1, Hp, Wp), lambda b: (b, 0, 0)),
                  pl.BlockSpec((1, Hp, Wp), lambda b: (b, 0, 0))],
        out_specs=pl.BlockSpec((1, 8, 128), lambda b: (b, 0, 0)),
        compiler_params=pltpu.CompilerParams(dimension_semantics=("parallel",)),
    )(hi, p_thin, t_thin)


def _pad_images(img, Hp, Wp):
    B, C, H, W = img.shape
    assert C == 1, "CannyEdge conv weights require a single input channel"
    x = img[:, 0].astype(jnp.float32)
    return jnp.pad(x, ((0, 0), (0, Hp - H), (0, Wp - W)))


def gradient_difference_loss_canny(pred, target):
    """pred, target: (B, 1, H, W) -> scalar mean((canny(target) - canny(pred))^2)."""
    B, _, H, W = pred.shape
    Hp, Wp = _round_up(H + 2, 8), _round_up(W + 2, 128)

    p_pad = _pad_images(pred, Hp, Wp)
    t_pad = _pad_images(target, Hp, Wp)

    # thin edges + per-image maxima for both branches
    p_thin, p_mx = _canny_thin(p_pad, H, W)
    t_thin, t_mx = _canny_thin(t_pad, H, W)

    # per-branch global (whole-batch) high thresholds, packed into one SMEM scalar array
    hi = (jnp.stack([jnp.max(p_mx), jnp.max(t_mx)]) * HIGH_THRESHOLD).astype(jnp.float32)

    # fused double-threshold + hysteresis (both branches) + squared-difference reduction
    sse = _hysteresis_pair_sse(p_thin, t_thin, hi, H, W)     # (B, 8, 128)

    return jnp.sum(sse[:, 0, 0]) / (B * H * W)


if __name__ == "__main__":
    key = jax.random.PRNGKey(0)
    k1, k2 = jax.random.split(key)
    B, C, H, W = 2, 1, 16, 16
    pred = jax.random.uniform(k1, (B, C, H, W), dtype=jnp.float32)
    target = jax.random.uniform(k2, (B, C, H, W), dtype=jnp.float32)

    loss = jax.jit(gradient_difference_loss_canny)(pred, target)
    jax.block_until_ready(loss)
    print("KERNEL_OK")
</pallas_src>

<mosaic_0001>
module attributes {stable_mosaic.version = 11 : i64} {
  func.func @_hyst_pair_sse_kernel(%arg0: i32, %arg1: memref<2xf32, #tpu.memory_space<smem>>, %arg2: memref<1x24x128xf32, #tpu.memory_space<vmem>>, %arg3: memref<1x24x128xf32, #tpu.memory_space<vmem>>, %arg4: memref<1x8x128xf32, #tpu.memory_space<vmem>>) attributes {dimension_semantics = [#tpu.dimension_semantics<parallel>], iteration_bounds = array<i64: 2>, scalar_prefetch = 0 : i64, scratch_operands = 0 : i64, tpu.core_type = #tpu.core_type<tc>, window_params = [{transform_indices = @transform_0, window_bounds = array<i64: 2>}, {transform_indices = @transform_1, window_bounds = array<i64: 1, 24, 128>}, {transform_indices = @transform_2, window_bounds = array<i64: 1, 24, 128>}, {transform_indices = @transform_3, window_bounds = array<i64: 1, 8, 128>}]} {
    %0 = tpu.iota {dimensions = array<i32: 0>} : vector<24x128xi32>
    %1 = tpu.iota {dimensions = array<i32: 1>} : vector<24x128xi32>
    %c16_i32 = arith.constant 16 : i32
    %2 = vector.broadcast %c16_i32 : i32 to vector<24x128xi32>
    %3 = arith.cmpi slt, %0, %2 : vector<24x128xi32>
    %c16_i32_0 = arith.constant 16 : i32
    %4 = vector.broadcast %c16_i32_0 : i32 to vector<24x128xi32>
    %5 = arith.cmpi slt, %1, %4 : vector<24x128xi32>
    %6 = arith.andi %3, %5 : vector<24x128xi1>
    %c0 = arith.constant 0 : index
    %c0_1 = arith.constant 0 : index
    %c0_2 = arith.constant 0 : index
    %7 = vector.load %arg2[%c0, %c0_1, %c0_2] : memref<1x24x128xf32, #tpu.memory_space<vmem>>, vector<1x24x128xf32>
    %8 = vector.shape_cast %7 : vector<1x24x128xf32> to vector<24x128xf32>
    %c0_3 = arith.constant 0 : index
    %9 = memref.load %arg1[%c0_3] : memref<2xf32, #tpu.memory_space<smem>>
    %10 = vector.broadcast %9 : f32 to vector<24x128xf32>
    %11 = arith.cmpf oge, %8, %10 : vector<24x128xf32>
    %12 = arith.andi %11, %6 : vector<24x128xi1>
    %13 = vector.broadcast %9 : f32 to vector<24x128xf32>
    %14 = arith.cmpf olt, %8, %13 : vector<24x128xf32>
    %cst = arith.constant 3.920000e-03 : f32
    %15 = vector.broadcast %cst : f32 to vector<24x128xf32>
    %16 = arith.cmpf oge, %8, %15 : vector<24x128xf32>
    %17 = arith.andi %14, %16 : vector<24x128xi1>
    %cst_4 = arith.constant 7.500000e+01 : f32
    %cst_5 = arith.constant 0.000000e+00 : f32
    %18 = vector.broadcast %cst_4 : f32 to vector<24x128xf32>
    %19 = vector.broadcast %cst_5 : f32 to vector<24x128xf32>
    %20 = arith.select %17, %18, %19 : vector<24x128xi1>, vector<24x128xf32>
    %cst_6 = arith.constant 2.550000e+02 : f32
    %21 = vector.broadcast %cst_6 : f32 to vector<24x128xf32>
    %22 = arith.select %12, %21, %20 : vector<24x128xi1>, vector<24x128xf32>
    %cst_7 = arith.constant 1.000000e+00 : f32
    %23:2 = scf.while (%arg5 = %22, %arg6 = %cst_7) : (vector<24x128xf32>, f32) -> (vector<24x128xf32>, f32) {
      %cst_26 = arith.constant 0.000000e+00 : f32
      %59 = arith.cmpf ogt, %arg6, %cst_26 : f32
      scf.condition(%59) %arg5, %arg6 : vector<24x128xf32>, f32
    } do {
    ^bb0(%arg5: vector<24x128xf32>, %arg6: f32):
      %cst_26 = arith.constant 7.500000e+01 : f32
      %59 = vector.broadcast %cst_26 : f32 to vector<24x128xf32>
      %60 = arith.cmpf oeq, %arg5, %59 : vector<24x128xf32>
      %cst_27 = arith.constant 2.550000e+02 : f32
      %61 = vector.broadcast %cst_27 : f32 to vector<24x128xf32>
      %62 = arith.cmpf oeq, %arg5, %61 : vector<24x128xf32>
      %cst_28 = arith.constant 1.000000e+00 : f32
      %cst_29 = arith.constant 0.000000e+00 : f32
      %63 = vector.broadcast %cst_28 : f32 to vector<24x128xf32>
      %64 = vector.broadcast %cst_29 : f32 to vector<24x128xf32>
      %65 = arith.select %62, %63, %64 : vector<24x128xi1>, vector<24x128xf32>
      %c127_i32 = arith.constant 127 : i32
      %66 = tpu.dynamic_rotate %65 by %c127_i32 dim 1 : vector<24x128xf32>, i32 -> vector<24x128xf32>
      %c1_i32 = arith.constant 1 : i32
      %67 = tpu.dynamic_rotate %65 by %c1_i32 dim 1 : vector<24x128xf32>, i32 -> vector<24x128xf32>
      %68 = arith.maximumf %66, %67 : vector<24x128xf32>
      %69 = arith.maximumf %65, %68 : vector<24x128xf32>
      %c23_i32 = arith.constant 23 : i32
      %70 = tpu.dynamic_rotate %69 by %c23_i32 dim 0 : vector<24x128xf32>, i32 -> vector<24x128xf32>
      %c1_i32_30 = arith.constant 1 : i32
      %71 = tpu.dynamic_rotate %69 by %c1_i32_30 dim 0 : vector<24x128xf32>, i32 -> vector<24x128xf32>
      %72 = arith.maximumf %70, %71 : vector<24x128xf32>
      %73 = arith.maximumf %69, %72 : vector<24x128xf32>
      %cst_31 = arith.constant 0.000000e+00 : f32
      %74 = vector.broadcast %cst_31 : f32 to vector<24x128xf32>
      %75 = arith.cmpf ogt, %73, %74 : vector<24x128xf32>
      %76 = arith.andi %60, %75 : vector<24x128xi1>
      %cst_32 = arith.constant 2.550000e+02 : f32
      %77 = vector.broadcast %cst_32 : f32 to vector<24x128xf32>
      %78 = arith.select %76, %77, %arg5 : vector<24x128xi1>, vector<24x128xf32>
      %79 = arith.extui %76 : vector<24x128xi1> to vector<24x128xi32>
      %80 = arith.sitofp %79 : vector<24x128xi32> to vector<24x128xf32>
      %81 = vector.shape_cast %80 : vector<24x128xf32> to vector<1x24x128xf32>
      %cst_33 = arith.constant dense<0xFF800000> : vector<1xf32>
      %82 = vector.multi_reduction <maximumf>, %81, %cst_33 [1, 2] : vector<1x24x128xf32> to vector<1xf32>
      %83 = vector.shape_cast %82 : vector<1xf32> to vector<1x1x1xf32>
      %84 = vector.extract %83[0, 0, 0] : f32 from vector<1x1x1xf32>
      scf.yield %78, %84 : vector<24x128xf32>, f32
    }
    %cst_8 = arith.constant 2.550000e+02 : f32
    %24 = vector.broadcast %cst_8 : f32 to vector<24x128xf32>
    %25 = arith.cmpf oeq, %23#0, %24 : vector<24x128xf32>
    %cst_9 = arith.constant 2.550000e+02 : f32
    %cst_10 = arith.constant 0.000000e+00 : f32
    %26 = vector.broadcast %cst_9 : f32 to vector<24x128xf32>
    %27 = vector.broadcast %cst_10 : f32 to vector<24x128xf32>
    %28 = arith.select %25, %26, %27 : vector<24x128xi1>, vector<24x128xf32>
    %c0_11 = arith.constant 0 : index
    %c0_12 = arith.constant 0 : index
    %c0_13 = arith.constant 0 : index
    %29 = vector.load %arg3[%c0_11, %c0_12, %c0_13] : memref<1x24x128xf32, #tpu.memory_space<vmem>>, vector<1x24x128xf32>
    %30 = vector.shape_cast %29 : vector<1x24x128xf32> to vector<24x128xf32>
    %c1 = arith.constant 1 : index
    %31 = memref.load %arg1[%c1] : memref<2xf32, #tpu.memory_space<smem>>
    %32 = vector.broadcast %31 : f32 to vector<24x128xf32>
    %33 = arith.cmpf oge, %30, %32 : vector<24x128xf32>
    %34 = arith.andi %33, %6 : vector<24x128xi1>
    %35 = vector.broadcast %31 : f32 to vector<24x128xf32>
    %36 = arith.cmpf olt, %30, %35 : vector<24x128xf32>
    %cst_14 = arith.constant 3.920000e-03 : f32
    %37 = vector.broadcast %cst_14 : f32 to vector<24x128xf32>
    %38 = arith.cmpf oge, %30, %37 : vector<24x128xf32>
    %39 = arith.andi %36, %38 : vector<24x128xi1>
    %cst_15 = arith.constant 7.500000e+01 : f32
    %cst_16 = arith.constant 0.000000e+00 : f32
    %40 = vector.broadcast %cst_15 : f32 to vector<24x128xf32>
    %41 = vector.broadcast %cst_16 : f32 to vector<24x128xf32>
    %42 = arith.select %39, %40, %41 : vector<24x128xi1>, vector<24x128xf32>
    %cst_17 = arith.constant 2.550000e+02 : f32
    %43 = vector.broadcast %cst_17 : f32 to vector<24x128xf32>
    %44 = arith.select %34, %43, %42 : vector<24x128xi1>, vector<24x128xf32>
    %cst_18 = arith.constant 1.000000e+00 : f32
    %45:2 = scf.while (%arg5 = %44, %arg6 = %cst_18) : (vector<24x128xf32>, f32) -> (vector<24x128xf32>, f32) {
      %cst_26 = arith.constant 0.000000e+00 : f32
      %59 = arith.cmpf ogt, %arg6, %cst_26 : f32
      scf.condition(%59) %arg5, %arg6 : vector<24x128xf32>, f32
    } do {
    ^bb0(%arg5: vector<24x128xf32>, %arg6: f32):
      %cst_26 = arith.constant 7.500000e+01 : f32
      %59 = vector.broadcast %cst_26 : f32 to vector<24x128xf32>
      %60 = arith.cmpf oeq, %arg5, %59 : vector<24x128xf32>
      %cst_27 = arith.constant 2.550000e+02 : f32
      %61 = vector.broadcast %cst_27 : f32 to vector<24x128xf32>
      %62 = arith.cmpf oeq, %arg5, %61 : vector<24x128xf32>
      %cst_28 = arith.constant 1.000000e+00 : f32
      %cst_29 = arith.constant 0.000000e+00 : f32
      %63 = vector.broadcast %cst_28 : f32 to vector<24x128xf32>
      %64 = vector.broadcast %cst_29 : f32 to vector<24x128xf32>
      %65 = arith.select %62, %63, %64 : vector<24x128xi1>, vector<24x128xf32>
      %c127_i32 = arith.constant 127 : i32
      %66 = tpu.dynamic_rotate %65 by %c127_i32 dim 1 : vector<24x128xf32>, i32 -> vector<24x128xf32>
      %c1_i32 = arith.constant 1 : i32
      %67 = tpu.dynamic_rotate %65 by %c1_i32 dim 1 : vector<24x128xf32>, i32 -> vector<24x128xf32>
      %68 = arith.maximumf %66, %67 : vector<24x128xf32>
      %69 = arith.maximumf %65, %68 : vector<24x128xf32>
      %c23_i32 = arith.constant 23 : i32
      %70 = tpu.dynamic_rotate %69 by %c23_i32 dim 0 : vector<24x128xf32>, i32 -> vector<24x128xf32>
      %c1_i32_30 = arith.constant 1 : i32
      %71 = tpu.dynamic_rotate %69 by %c1_i32_30 dim 0 : vector<24x128xf32>, i32 -> vector<24x128xf32>
      %72 = arith.maximumf %70, %71 : vector<24x128xf32>
      %73 = arith.maximumf %69, %72 : vector<24x128xf32>
      %cst_31 = arith.constant 0.000000e+00 : f32
      %74 = vector.broadcast %cst_31 : f32 to vector<24x128xf32>
      %75 = arith.cmpf ogt, %73, %74 : vector<24x128xf32>
      %76 = arith.andi %60, %75 : vector<24x128xi1>
      %cst_32 = arith.constant 2.550000e+02 : f32
      %77 = vector.broadcast %cst_32 : f32 to vector<24x128xf32>
      %78 = arith.select %76, %77, %arg5 : vector<24x128xi1>, vector<24x128xf32>
      %79 = arith.extui %76 : vector<24x128xi1> to vector<24x128xi32>
      %80 = arith.sitofp %79 : vector<24x128xi32> to vector<24x128xf32>
      %81 = vector.shape_cast %80 : vector<24x128xf32> to vector<1x24x128xf32>
      %cst_33 = arith.constant dense<0xFF800000> : vector<1xf32>
      %82 = vector.multi_reduction <maximumf>, %81, %cst_33 [1, 2] : vector<1x24x128xf32> to vector<1xf32>
      %83 = vector.shape_cast %82 : vector<1xf32> to vector<1x1x1xf32>
      %84 = vector.extract %83[0, 0, 0] : f32 from vector<1x1x1xf32>
      scf.yield %78, %84 : vector<24x128xf32>, f32
    }
    %cst_19 = arith.constant 2.550000e+02 : f32
    %46 = vector.broadcast %cst_19 : f32 to vector<24x128xf32>
    %47 = arith.cmpf oeq, %45#0, %46 : vector<24x128xf32>
    %cst_20 = arith.constant 2.550000e+02 : f32
    %cst_21 = arith.constant 0.000000e+00 : f32
    %48 = vector.broadcast %cst_20 : f32 to vector<24x128xf32>
    %49 = vector.broadcast %cst_21 : f32 to vector<24x128xf32>
    %50 = arith.select %47, %48, %49 : vector<24x128xi1>, vector<24x128xf32>
    %51 = arith.subf %50, %28 : vector<24x128xf32>
    %52 = arith.mulf %51, %51 : vector<24x128xf32>
    %53 = vector.shape_cast %52 : vector<24x128xf32> to vector<1x24x128xf32>
    %cst_22 = arith.constant dense<0.000000e+00> : vector<1xf32>
    %54 = vector.multi_reduction <add>, %53, %cst_22 [1, 2] : vector<1x24x128xf32> to vector<1xf32>
    %55 = vector.shape_cast %54 : vector<1xf32> to vector<1x1x1xf32>
    %56 = vector.extract %55[0, 0, 0] : f32 from vector<1x1x1xf32>
    %57 = vector.broadcast %56 : f32 to vector<1x8x128xf32>
    %c0_23 = arith.constant 0 : index
    %c0_24 = arith.constant 0 : index
    %c0_25 = arith.constant 0 : index
    %58 = vector.load %arg4[%c0_23, %c0_24, %c0_25] : memref<1x8x128xf32, #tpu.memory_space<vmem>>, vector<1x8x128xf32>
    tpu.vector_store %arg4[%c0_23, %c0_24, %c0_25], %57 {strides = array<i32>} : memref<1x8x128xf32, #tpu.memory_space<vmem>>, vector<1x8x128xf32>,
    return
  }
  func.func @transform_0(%arg0: i32) -> i32 {
    %c0_i32 = arith.constant 0 : i32
    %c0_i32_0 = arith.constant 0 : i32
    return %c0_i32 : i32
  }
  func.func @transform_1(%arg0: i32) -> (i32, i32, i32) {
    %c0_i32 = arith.constant 0 : i32
    %c0_i32_0 = arith.constant 0 : i32
    %c0_i32_1 = arith.constant 0 : i32
    return %arg0, %c0_i32, %c0_i32_0 : i32, i32, i32
  }
  func.func @transform_2(%arg0: i32) -> (i32, i32, i32) {
    %c0_i32 = arith.constant 0 : i32
    %c0_i32_0 = arith.constant 0 : i32
    %c0_i32_1 = arith.constant 0 : i32
    return %arg0, %c0_i32, %c0_i32_0 : i32, i32, i32
  }
  func.func @transform_3(%arg0: i32) -> (i32, i32, i32) {
    %c0_i32 = arith.constant 0 : i32
    %c0_i32_0 = arith.constant 0 : i32
    %c0_i32_1 = arith.constant 0 : i32
    return %arg0, %c0_i32, %c0_i32_0 : i32, i32, i32
  }
}

module attributes {stable_mosaic.version = 11 : i64} {
  func.func @_canny_thin_kernel(%arg0: i32, %arg1: memref<1x24x128xf32, #tpu.memory_space<vmem>>, %arg2: memref<1x24x128xf32, #tpu.memory_space<vmem>>, %arg3: memref<1x8x128xf32, #tpu.memory_space<vmem>>) attributes {dimension_semantics = [#tpu.dimension_semantics<parallel>], iteration_bounds = array<i64: 2>, scalar_prefetch = 0 : i64, scratch_operands = 0 : i64, tpu.core_type = #tpu.core_type<tc>, window_params = [{transform_indices = @transform_0, window_bounds = array<i64: 1, 24, 128>}, {transform_indices = @transform_1, window_bounds = array<i64: 1, 24, 128>}, {transform_indices = @transform_2, window_bounds = array<i64: 1, 8, 128>}]} {
    %c0 = arith.constant 0 : index
    %c0_0 = arith.constant 0 : index
    %c0_1 = arith.constant 0 : index
    %0 = vector.load %arg1[%c0, %c0_0, %c0_1] : memref<1x24x128xf32, #tpu.memory_space<vmem>>, vector<1x24x128xf32>
    %1 = vector.shape_cast %0 : vector<1x24x128xf32> to vector<24x128xf32>
    %2 = tpu.iota {dimensions = array<i32: 0>} : vector<24x128xi32>
    %3 = tpu.iota {dimensions = array<i32: 1>} : vector<24x128xi32>
    %c16_i32 = arith.constant 16 : i32
    %4 = vector.broadcast %c16_i32 : i32 to vector<24x128xi32>
    %5 = arith.cmpi slt, %2, %4 : vector<24x128xi32>
    %c16_i32_2 = arith.constant 16 : i32
    %6 = vector.broadcast %c16_i32_2 : i32 to vector<24x128xi32>
    %7 = arith.cmpi slt, %3, %6 : vector<24x128xi32>
    %8 = arith.andi %5, %7 : vector<24x128xi1>
    %c2_i32 = arith.constant 2 : i32
    %9 = tpu.dynamic_rotate %1 by %c2_i32 dim 1 : vector<24x128xf32>, i32 -> vector<24x128xf32>
    %cst = arith.constant 0.135335281 : f32
    %10 = vector.broadcast %cst : f32 to vector<24x128xf32>
    %11 = arith.mulf %9, %10 : vector<24x128xf32>
    %c1_i32 = arith.constant 1 : i32
    %12 = tpu.dynamic_rotate %1 by %c1_i32 dim 1 : vector<24x128xf32>, i32 -> vector<24x128xf32>
    %cst_3 = arith.constant 0.606530666 : f32
    %13 = vector.broadcast %cst_3 : f32 to vector<24x128xf32>
    %14 = arith.mulf %12, %13 : vector<24x128xf32>
    %15 = arith.addf %11, %14 : vector<24x128xf32>
    %16 = arith.addf %15, %1 : vector<24x128xf32>
    %c127_i32 = arith.constant 127 : i32
    %17 = tpu.dynamic_rotate %1 by %c127_i32 dim 1 : vector<24x128xf32>, i32 -> vector<24x128xf32>
    %cst_4 = arith.constant 0.606530666 : f32
    %18 = vector.broadcast %cst_4 : f32 to vector<24x128xf32>
    %19 = arith.mulf %17, %18 : vector<24x128xf32>
    %20 = arith.addf %16, %19 : vector<24x128xf32>
    %c126_i32 = arith.constant 126 : i32
    %21 = tpu.dynamic_rotate %1 by %c126_i32 dim 1 : vector<24x128xf32>, i32 -> vector<24x128xf32>
    %cst_5 = arith.constant 0.135335281 : f32
    %22 = vector.broadcast %cst_5 : f32 to vector<24x128xf32>
    %23 = arith.mulf %21, %22 : vector<24x128xf32>
    %24 = arith.addf %20, %23 : vector<24x128xf32>
    %c2_i32_6 = arith.constant 2 : i32
    %25 = tpu.dynamic_rotate %24 by %c2_i32_6 dim 0 : vector<24x128xf32>, i32 -> vector<24x128xf32>
    %cst_7 = arith.constant 0.135335281 : f32
    %26 = vector.broadcast %cst_7 : f32 to vector<24x128xf32>
    %27 = arith.mulf %25, %26 : vector<24x128xf32>
    %c1_i32_8 = arith.constant 1 : i32
    %28 = tpu.dynamic_rotate %24 by %c1_i32_8 dim 0 : vector<24x128xf32>, i32 -> vector<24x128xf32>
    %cst_9 = arith.constant 0.606530666 : f32
    %29 = vector.broadcast %cst_9 : f32 to vector<24x128xf32>
    %30 = arith.mulf %28, %29 : vector<24x128xf32>
    %31 = arith.addf %27, %30 : vector<24x128xf32>
    %32 = arith.addf %31, %24 : vector<24x128xf32>
    %c23_i32 = arith.constant 23 : i32
    %33 = tpu.dynamic_rotate %24 by %c23_i32 dim 0 : vector<24x128xf32>, i32 -> vector<24x128xf32>
    %cst_10 = arith.constant 0.606530666 : f32
    %34 = vector.broadcast %cst_10 : f32 to vector<24x128xf32>
    %35 = arith.mulf %33, %34 : vector<24x128xf32>
    %36 = arith.addf %32, %35 : vector<24x128xf32>
    %c22_i32 = arith.constant 22 : i32
    %37 = tpu.dynamic_rotate %24 by %c22_i32 dim 0 : vector<24x128xf32>, i32 -> vector<24x128xf32>
    %cst_11 = arith.constant 0.135335281 : f32
    %38 = vector.broadcast %cst_11 : f32 to vector<24x128xf32>
    %39 = arith.mulf %37, %38 : vector<24x128xf32>
    %40 = arith.addf %36, %39 : vector<24x128xf32>
    %cst_12 = arith.constant 0.000000e+00 : f32
    %41 = vector.broadcast %cst_12 : f32 to vector<24x128xf32>
    %42 = arith.select %8, %40, %41 : vector<24x128xi1>, vector<24x128xf32>
    %c1_i32_13 = arith.constant 1 : i32
    %43 = tpu.dynamic_rotate %42 by %c1_i32_13 dim 1 : vector<24x128xf32>, i32 -> vector<24x128xf32>
    %c127_i32_14 = arith.constant 127 : i32
    %44 = tpu.dynamic_rotate %42 by %c127_i32_14 dim 1 : vector<24x128xf32>, i32 -> vector<24x128xf32>
    %cst_15 = arith.constant -1.000000e+00 : f32
    %45 = vector.broadcast %cst_15 : f32 to vector<24x128xf32>
    %46 = arith.mulf %44, %45 : vector<24x128xf32>
    %47 = arith.addf %43, %46 : vector<24x128xf32>
    %c1_i32_16 = arith.constant 1 : i32
    %48 = tpu.dynamic_rotate %47 by %c1_i32_16 dim 0 : vector<24x128xf32>, i32 -> vector<24x128xf32>
    %cst_17 = arith.constant 2.000000e+00 : f32
    %49 = vector.broadcast %cst_17 : f32 to vector<24x128xf32>
    %50 = arith.mulf %47, %49 : vector<24x128xf32>
    %51 = arith.addf %48, %50 : vector<24x128xf32>
    %c23_i32_18 = arith.constant 23 : i32
    %52 = tpu.dynamic_rotate %47 by %c23_i32_18 dim 0 : vector<24x128xf32>, i32 -> vector<24x128xf32>
    %53 = arith.addf %51, %52 : vector<24x128xf32>
    %c1_i32_19 = arith.constant 1 : i32
    %54 = tpu.dynamic_rotate %42 by %c1_i32_19 dim 1 : vector<24x128xf32>, i32 -> vector<24x128xf32>
    %cst_20 = arith.constant 2.000000e+00 : f32
    %55 = vector.broadcast %cst_20 : f32 to vector<24x128xf32>
    %56 = arith.mulf %42, %55 : vector<24x128xf32>
    %57 = arith.addf %54, %56 : vector<24x128xf32>
    %c127_i32_21 = arith.constant 127 : i32
    %58 = tpu.dynamic_rotate %42 by %c127_i32_21 dim 1 : vector<24x128xf32>, i32 -> vector<24x128xf32>
    %59 = arith.addf %57, %58 : vector<24x128xf32>
    %c1_i32_22 = arith.constant 1 : i32
    %60 = tpu.dynamic_rotate %59 by %c1_i32_22 dim 0 : vector<24x128xf32>, i32 -> vector<24x128xf32>
    %c23_i32_23 = arith.constant 23 : i32
    %61 = tpu.dynamic_rotate %59 by %c23_i32_23 dim 0 : vector<24x128xf32>, i32 -> vector<24x128xf32>
    %cst_24 = arith.constant -1.000000e+00 : f32
    %62 = vector.broadcast %cst_24 : f32 to vector<24x128xf32>
    %63 = arith.mulf %61, %62 : vector<24x128xf32>
    %64 = arith.addf %60, %63 : vector<24x128xf32>
    %65 = arith.mulf %53, %53 : vector<24x128xf32>
    %66 = arith.mulf %64, %64 : vector<24x128xf32>
    %67 = arith.addf %65, %66 : vector<24x128xf32>
    %68 = math.sqrt %67 : vector<24x128xf32>
    %cst_25 = arith.constant 0.000000e+00 : f32
    %69 = vector.broadcast %cst_25 : f32 to vector<24x128xf32>
    %70 = arith.select %8, %68, %69 : vector<24x128xi1>, vector<24x128xf32>
    %71 = vector.shape_cast %70 : vector<24x128xf32> to vector<1x24x128xf32>
    %cst_26 = arith.constant dense<0xFF800000> : vector<1xf32>
    %72 = vector.multi_reduction <maximumf>, %71, %cst_26 [1, 2] : vector<1x24x128xf32> to vector<1xf32>
    %73 = vector.shape_cast %72 : vector<1xf32> to vector<1x1x1xf32>
    %74 = vector.extract %73[0, 0, 0] : f32 from vector<1x1x1xf32>
    %75 = vector.broadcast %74 : f32 to vector<24x128xf32>
    %76 = arith.divf %70, %75 : vector<24x128xf32>
    %c23_i32_27 = arith.constant 23 : i32
    %77 = tpu.dynamic_rotate %76 by %c23_i32_27 dim 0 : vector<24x128xf32>, i32 -> vector<24x128xf32>
    %c1_i32_28 = arith.constant 1 : i32
    %78 = tpu.dynamic_rotate %76 by %c1_i32_28 dim 0 : vector<24x128xf32>, i32 -> vector<24x128xf32>
    %c127_i32_29 = arith.constant 127 : i32
    %79 = tpu.dynamic_rotate %76 by %c127_i32_29 dim 1 : vector<24x128xf32>, i32 -> vector<24x128xf32>
    %c1_i32_30 = arith.constant 1 : i32
    %80 = tpu.dynamic_rotate %76 by %c1_i32_30 dim 1 : vector<24x128xf32>, i32 -> vector<24x128xf32>
    %c127_i32_31 = arith.constant 127 : i32
    %81 = tpu.dynamic_rotate %77 by %c127_i32_31 dim 1 : vector<24x128xf32>, i32 -> vector<24x128xf32>
    %c1_i32_32 = arith.constant 1 : i32
    %82 = tpu.dynamic_rotate %77 by %c1_i32_32 dim 1 : vector<24x128xf32>, i32 -> vector<24x128xf32>
    %c127_i32_33 = arith.constant 127 : i32
    %83 = tpu.dynamic_rotate %78 by %c127_i32_33 dim 1 : vector<24x128xf32>, i32 -> vector<24x128xf32>
    %c1_i32_34 = arith.constant 1 : i32
    %84 = tpu.dynamic_rotate %78 by %c1_i32_34 dim 1 : vector<24x128xf32>, i32 -> vector<24x128xf32>
    %85 = math.absf %53 : vector<24x128xf32>
    %86 = math.absf %64 : vector<24x128xf32>
    %cst_35 = arith.constant 0.414213568 : f32
    %87 = vector.broadcast %cst_35 : f32 to vector<24x128xf32>
    %88 = arith.mulf %87, %85 : vector<24x128xf32>
    %89 = arith.cmpf ole, %86, %88 : vector<24x128xf32>
    %cst_36 = arith.constant 0.414213568 : f32
    %90 = vector.broadcast %cst_36 : f32 to vector<24x128xf32>
    %91 = arith.mulf %90, %86 : vector<24x128xf32>
    %92 = arith.cmpf ole, %85, %91 : vector<24x128xf32>
    %cst_37 = arith.constant 0.000000e+00 : f32
    %93 = vector.broadcast %cst_37 : f32 to vector<24x128xf32>
    %94 = arith.cmpf ogt, %64, %93 : vector<24x128xf32>
    %cst_38 = arith.constant 0.000000e+00 : f32
    %95 = vector.broadcast %cst_38 : f32 to vector<24x128xf32>
    %96 = arith.cmpf ogt, %53, %95 : vector<24x128xf32>
    %97 = arith.xori %94, %96 : vector<24x128xi1>
    %cst_39 = arith.constant dense<true> : vector<24x128xi1>
    %98 = arith.xori %97, %cst_39 : vector<24x128xi1>
    %99 = arith.maximumf %79, %80 : vector<24x128xf32>
    %100 = arith.maximumf %77, %78 : vector<24x128xf32>
    %101 = arith.maximumf %81, %84 : vector<24x128xf32>
    %102 = arith.maximumf %82, %83 : vector<24x128xf32>
    %103 = arith.select %98, %101, %102 : vector<24x128xi1>, vector<24x128xf32>
    %104 = arith.select %92, %100, %103 : vector<24x128xi1>, vector<24x128xf32>
    %105 = arith.select %89, %99, %104 : vector<24x128xi1>, vector<24x128xf32>
    %106 = arith.cmpf ogt, %76, %105 : vector<24x128xf32>
    %cst_40 = arith.constant 0.000000e+00 : f32
    %107 = vector.broadcast %cst_40 : f32 to vector<24x128xf32>
    %108 = arith.select %106, %76, %107 : vector<24x128xi1>, vector<24x128xf32>
    %c0_41 = arith.constant 0 : index
    %c0_42 = arith.constant 0 : index
    %c0_43 = arith.constant 0 : index
    %109 = vector.load %arg2[%c0_41, %c0_42, %c0_43] : memref<1x24x128xf32, #tpu.memory_space<vmem>>, vector<1x24x128xf32>
    %110 = vector.shape_cast %109 : vector<1x24x128xf32> to vector<24x128xf32>
    %111 = vector.shape_cast %108 : vector<24x128xf32> to vector<1x24x128xf32>
    tpu.vector_store %arg2[%c0_41, %c0_42, %c0_43], %111 {strides = array<i32>} : memref<1x24x128xf32, #tpu.memory_space<vmem>>, vector<1x24x128xf32>,
    %112 = vector.shape_cast %108 : vector<24x128xf32> to vector<1x24x128xf32>
    %cst_44 = arith.constant dense<0xFF800000> : vector<1xf32>
    %113 = vector.multi_reduction <maximumf>, %112, %cst_44 [1, 2] : vector<1x24x128xf32> to vector<1xf32>
    %114 = vector.shape_cast %113 : vector<1xf32> to vector<1x1x1xf32>
    %115 = vector.extract %114[0, 0, 0] : f32 from vector<1x1x1xf32>
    %116 = vector.broadcast %115 : f32 to vector<1x8x128xf32>
    %c0_45 = arith.constant 0 : index
    %c0_46 = arith.constant 0 : index
    %c0_47 = arith.constant 0 : index
    %117 = vector.load %arg3[%c0_45, %c0_46, %c0_47] : memref<1x8x128xf32, #tpu.memory_space<vmem>>, vector<1x8x128xf32>
    tpu.vector_store %arg3[%c0_45, %c0_46, %c0_47], %116 {strides = array<i32>} : memref<1x8x128xf32, #tpu.memory_space<vmem>>, vector<1x8x128xf32>,
    return
  }
  func.func @transform_0(%arg0: i32) -> (i32, i32, i32) {
    %c0_i32 = arith.constant 0 : i32
    %c0_i32_0 = arith.constant 0 : i32
    %c0_i32_1 = arith.constant 0 : i32
    return %arg0, %c0_i32, %c0_i32_0 : i32, i32, i32
  }
  func.func @transform_1(%arg0: i32) -> (i32, i32, i32) {
    %c0_i32 = arith.constant 0 : i32
    %c0_i32_0 = arith.constant 0 : i32
    %c0_i32_1 = arith.constant 0 : i32
    return %arg0, %c0_i32, %c0_i32_0 : i32, i32, i32
  }
  func.func @transform_2(%arg0: i32) -> (i32, i32, i32) {
    %c0_i32 = arith.constant 0 : i32
    %c0_i32_0 = arith.constant 0 : i32
    %c0_i32_1 = arith.constant 0 : i32
    return %arg0, %c0_i32, %c0_i32_0 : i32, i32, i32
  }
}

</mosaic_0001>

<bundles_post_ra>
// kernel: gradient_difference_loss_canny.5
= control target key start
LH: loop header
LB: loop body
LE: loop exit
PB: predicated region body
PF: predicated region fallthrough
CT: control target
= control target key end

     0   :  { %8 = vsyncpa [#allocation3], 0  ;;  %s789_s12 = smov 0   ;;  %s932_s0 = inlined_call_operand.vmem [shape: f32[2], index: 0, kind: input, shape index: {}]   ;;  %s933_s1 = inlined_call_operand.vmem [shape: f32[2,24,128], index: 1, kind: input, shape index: {}]   ;;  %s934_s2 = inlined_call_operand.vmem [shape: f32[2,24,128], index: 2, kind: input, shape index: {}]   ;;  %s935_s3 = inlined_call_operand.vmem [shape: f32[2,8,128], index: 3, kind: output, shape index: {}]  }
   0x1 LB: > { %s566_s13 = sadd.s32 4294967295, %s735_s12   ;;  %p568_p0 = scmp.ge.s32.totalorder %s735_s12, 1  ;;  %s735_s12 = sphi %s789_s12, %s14_s12  }
   0x2   : > { %p118_p1 = scmp.lt.s32.totalorder %s735_s12, 3  ;;  %s130_s16 = sshll.u32 %s932_s0, 4  ;;  %s131_s16 = int_to_ptr.vmem [resolvable:$true] %s130_s16 }
   0x3   : > { %p600_p3 = scmp.eq.s32.totalorder %s566_s13, 0  ;;  %s761_s17 = smov [#allocation2]  }
   0x4   : > { %p119_p2 = pnand %p568_p0, %p118_p1 }
   0x6   : > { %p596_p4 = pneg %p119_p2  ;;  %159 = sbr.rel (%p119_p2) target bundleno = 888 (0x378), region = 32 }
   0x8   : > { %p597_p5 = pnand %p600_p3, %p596_p4 }
   0xa   : > { %599 = dma.vmem_to_smem (!%p597_p5), %s131_s16, 16, %s761_s17, [#allocation3]  }
   0xb   : > { %730 = dma.done.wait (%p600_p3), [#allocation3], 16  }
   0xc   : > { %732 = vsyncadd (%p600_p3), [#allocation3], 4294967280 }
   0xd   : > { %166 = sfence }
   0xe   : > { %p189_p6 = scmp.lt.s32.totalorder %s566_s13, 1  ;;  %v203_v0 = vlaneseq  ;;  %s219_s18 = sld [smem:[#allocation2]]  ;;  %v762_v8 = vmov 0.0  }
  0x10   : > { %s947_s13 = smov (!%p189_p6, %s566_s13), 1  ;;  %v800_v1 = vshrl.u32 %v203_v0, 7  ;;  %v802_v2 = vand.u32 127, %v203_v0 }
  0x11   : > { %s585_s19 = smul.u32 24, %s947_s13  ;;  %s575_s20 = sshll.u32 %s947_s13, 3 }
  0x12   : > { %s807_s23 = scalar_lea.vmem %s935_s3, %s575_s20  ;;  %vm212_vm0 = vcmp.lt.s32.totalorder %v802_v2, 16 }
  0x13   : > { %s193_s26 = scalar_lea.vmem %s933_s1, %s585_s19  ;;  %s815_s29 = scalar_lea.vmem %s934_s2, %s585_s19 }
  0x14   : > { %v220_v3 = vstv %s219_s18  ;;  %v216_v4 = vld [vmem:[%s193_s26] sm:$0xff]  ;;  %v217_v5 = vld [vmem:[%s193_s26 + $0x8] sm:$0xff]  ;;  %v218_v6 = vld [vmem:[%s193_s26 + $0x10] sm:$0xff] }
  0x15   : > { %vm221_vm1 = vcmp.ge.f32.partialorder %v216_v4, %v220_v3  ;;  %vm222_vm2 = vcmp.ge.f32.partialorder %v217_v5, %v220_v3  ;;  %vm227_vm3 = vcmp.lt.f32.partialorder %v216_v4, %v220_v3  ;;  %vm228_vm5 = vcmp.lt.f32.partialorder %v217_v5, %v220_v3 }
  0x16   : > { %vm820_vm4 = vmand %vm221_vm1, %vm212_vm0  ;;  %vm230_vm6 = vcmp.ge.f32.partialorder %v216_v4, 0.00392  ;;  %vm231_vm7 = vcmp.ge.f32.partialorder %v217_v5, 0.00392  ;;  %vm229_vm9 = vcmp.lt.f32.partialorder %v218_v6, %v220_v3  ;;  %vm232_vm10 = vcmp.ge.f32.partialorder %v218_v6, 0.00392 }
  0x17   : > { %vm225_vm8 = vmand %vm222_vm2, %vm212_vm0 }
  0x18   : > { %vm233_vm11 = vmand %vm227_vm3, %vm230_vm6 }
  0x19   : > { %vm234_vm12 = vmand %vm228_vm5, %vm231_vm7  ;;  %v236_v9 = vsel %vm233_vm11, 75.0, %v762_v8 }
  0x1a   : > { %vm235_vm13 = vmand %vm229_vm9, %vm232_vm10  ;;  %v237_v10 = vsel %vm234_vm12, 75.0, %v762_v8  ;;  %v239_v11 = vsel %vm820_vm4, 255.0, %v236_v9  }
  0x1b   : > { %v238_v12 = vsel %vm235_vm13, 75.0, %v762_v8   ;;  %v240_v13 = vsel %vm225_vm8, 255.0, %v237_v10  }
  0x1c LB: >> { %vm254_vm14 = vcmp.eq.f32.partialorder %v747_v11, 255.0  ;;  %vm255_vm15 = vcmp.eq.f32.partialorder %v743_v13, 255.0  ;;  %v763_v14 = vmov 0.0   ;;  %s764_s30 = smov 1   ;;  %s765_s4 = smov 127   ;;  %vm256_vm1 = vcmp.eq.f32.partialorder %v739_v12, 255.0  ;;  %v747_v11 = vphi %v239_v11, %v940_v11   ;;  %v743_v13 = vphi %v240_v13, %v939_v13   ;;  %v739_v12 = vphi %v238_v12, %v938_v12  }
  0x1d   : >> { %v257_v15 = vsel %vm254_vm14, 1.0, %v763_v14  ;;  %v258_v16 = vsel %vm255_vm15, 1.0, %v763_v14  ;;  %v259_v18 = vsel %vm256_vm1, 1.0, %v763_v14  ;;  %vm281_vm2 = vcmp.lt.s32.totalorder %v800_v1, 7 }
  0x1e   : >> { %v671_v17 = vpack.i.bf16 %v258_v16, %v257_v15  ;;  %vm288_vm3 = vcmp.lt.s32.totalorder %v800_v1, 1  ;;  %vm251_vm4 = vcmp.eq.f32.partialorder %v747_v11, 75.0  ;;  %vm252_vm5 = vcmp.eq.f32.partialorder %v743_v13, 75.0 }
  0x1f   : >> { %vm253_vm6 = vcmp.eq.f32.partialorder %v739_v12, 75.0 }
  0x20   : >> { %672 = vrot.lane.b32.xlu1 %v671_v17, %s764_s30  ;;  %667 = vrot.lane.b32.xlu0 %v671_v17, %s765_s4 }
  0x28   : >> { %270 = vrot.lane.b32.xlu1 %v259_v18, %s764_s30  ;;  %264 = vrot.lane.b32.xlu0 %v259_v18, %s765_s4 }
  0x92   : >> { %v673_v19 = vpop.permute.xlu1 %672  ;;  %v668_v20 = vpop.permute.xlu0 %667 }
  0x93   : >> { %v675_v21 = vunpack.i.h.bf16 %v673_v19  ;;  %v674_v22 = vunpack.i.l.bf16 %v673_v19  ;;  %v670_v23 = vunpack.i.h.bf16 %v668_v20  ;;  %v669_v24 = vunpack.i.l.bf16 %v668_v20 }
  0x95   : >> { %v273_v25 = vmax.f32 %v670_v23, %v675_v21  ;;  %v272_v26 = vmax.f32 %v669_v24, %v674_v22 }
  0x97   : >> { %v276_v27 = vmax.f32 %v258_v16, %v273_v25  ;;  %v275_v28 = vmax.f32 %v257_v15, %v272_v26 }
  0x99   : >> { %v279_v32 = vrot.slane %v276_v27, 1  ;;  %v286_v33 = vrot.slane %v276_v27, 7  ;;  %v278_v34 = vrot.slane %v275_v28, 1  ;;  %v285_v35 = vrot.slane %v275_v28, 7 }
  0x9a   : >> { %v271_v29 = vpop.permute.xlu1 %270  ;;  %v265_v30 = vpop.permute.xlu0 %264 }
  0x9b   : >> { %v274_v31 = vmax.f32 %v265_v30, %v271_v29  ;;  %v283_v39 = vsel %vm281_vm2, %v278_v34, %v279_v32  ;;  %v290_v40 = vsel %vm288_vm3, %v285_v35, %v286_v33 }
  0x9d   : >> { %v277_v36 = vmax.f32 %v259_v18, %v274_v31 }
  0x9f   : >> { %v280_v37 = vrot.slane %v277_v36, 1  ;;  %v287_v38 = vrot.slane %v277_v36, 7 }
  0xa1   : >> { %v282_v41 = vsel %vm281_vm2, %v279_v32, %v280_v37  ;;  %v284_v42 = vsel %vm281_vm2, %v280_v37, %v278_v34  ;;  %v289_v43 = vsel %vm288_vm3, %v286_v33, %v287_v38  ;;  %v291_v44 = vsel %vm288_vm3, %v287_v38, %v285_v35 }
  0xa2   : >> { %v292_v45 = vmax.f32 %v283_v39, %v291_v44  ;;  %v293_v46 = vmax.f32 %v282_v41, %v290_v40  ;;  %v294_v47 = vmax.f32 %v284_v42, %v289_v43 }
  0xa4   : >> { %v295_v48 = vmax.f32 %v275_v28, %v292_v45  ;;  %v296_v49 = vmax.f32 %v276_v27, %v293_v46  ;;  %v297_v50 = vmax.f32 %v277_v36, %v294_v47 }
  0xa6   : >> { %vm298_vm7 = vcmp.gt.f32.partialorder %v295_v48, 0.0  ;;  %vm299_vm8 = vcmp.gt.f32.partialorder %v296_v49, 0.0  ;;  %vm300_vm9 = vcmp.gt.f32.partialorder %v297_v50, 0.0 }
  0xa7   : >> { %vm301_vm10 = vmand %vm251_vm4, %vm298_vm7 }
  0xa8   : >> { %vm302_vm11 = vmand %vm252_vm5, %vm299_vm8  ;;  %v304_v51 = vsel %vm301_vm10, 255.0, %v747_v11   ;;  %v576_v52 = vsel %vm301_vm10, 1.0, %v763_v14 }
  0xa9   : >> { %vm303_vm12 = vmand %vm253_vm6, %vm300_vm9  ;;  %v305_v53 = vsel %vm302_vm11, 255.0, %v743_v13   ;;  %v577_v54 = vsel %vm302_vm11, 1.0, %v763_v14  ;;  %v940_v11 = vmov %v304_v51 }
  0xaa   : >> { %v313_v55 = vmax.f32 %v576_v52, %v577_v54  ;;  %v306_v56 = vsel %vm303_vm12, 255.0, %v739_v12   ;;  %v578_v57 = vsel %vm303_vm12, 1.0, %v763_v14  ;;  %v939_v13 = vmov %v305_v53 }
  0xab   : >> { %v938_v12 = vmov %v306_v56 }
  0xac   : >> { %v314_v58 = vmax.f32 %v313_v55, %v578_v57 }
  0xae   : >> { %315 = vmax.xlane.f32.xlu2 %v314_v58 }
 0x121   : >> { %v316_v59 = vpop.xlane.xlu2 %315 }
 0x122   : >> { %v317_v60 = vrot.slane %v316_v59, 4 }
 0x124   : >> { %v318_v61 = vmax.f32 %v316_v59, %v317_v60 }
 0x126   : >> { %v319_v62 = vrot.slane %v318_v61, 2 }
 0x128   : >> { %v320_v63 = vmax.f32 %v318_v61, %v319_v62 }
 0x12a   : >> { %v321_v0 = vrot.slane %v320_v63, 1 }
 0x12c   : >> { %v322_v3 = vmax.f32 %v320_v63, %v321_v0 }
 0x12e   : >> { %586 = vpush %v322_v3 }
 0x15f   : >> { %s587_s5 = spop %586 }
 0x160   : >> { %p247_p7 = scmp.gt.f32.partialorder %s587_s5, 0.0 }
 0x161   : > { %s579_s6 = sld [smem:[#allocation2 + $0x1]] (!%p247_p7) }
 0x162   : > { %250 = sbr.rel (%p247_p7) target bundleno = 28 (0x1c), region = 84 }
 0x167   : > { %vm324_vm13 = vcmp.eq.f32.partialorder %v304_v51, 255.0  ;;  %vm325_vm14 = vcmp.eq.f32.partialorder %v305_v53, 255.0  ;;  %vm326_vm15 = vcmp.eq.f32.partialorder %v306_v56, 255.0  ;;  %v330_v7 = vld [vmem:[%s815_s29] sm:$0xff]  ;;  %v331_v9 = vld [vmem:[%s815_s29 + $0x8] sm:$0xff]  ;;  %v332_v10 = vld [vmem:[%s815_s29 + $0x10] sm:$0xff]  ;;  %v334_v11 = vstv %s579_s6 }
 0x168   : > { %v866_v4 = vsel %vm324_vm13, 255.0, %v762_v8  ;;  %v869_v5 = vsel %vm325_vm14, 255.0, %v762_v8  ;;  %v872_v6 = vsel %vm326_vm15, 255.0, %v762_v8  ;;  %vm335_vm1 = vcmp.ge.f32.partialorder %v330_v7, %v334_v11 }
 0x169   : > { %vm336_vm4 = vcmp.ge.f32.partialorder %v331_v9, %v334_v11  ;;  %vm341_vm5 = vcmp.lt.f32.partialorder %v330_v7, %v334_v11  ;;  %vm344_vm6 = vcmp.ge.f32.partialorder %v330_v7, 0.00392  ;;  %vm879_vm7 = vmand %vm335_vm1, %vm212_vm0  ;;  %vm342_vm8 = vcmp.lt.f32.partialorder %v331_v9, %v334_v11 }
 0x16a   : > { %vm345_vm9 = vcmp.ge.f32.partialorder %v331_v9, 0.00392  ;;  %vm339_vm10 = vmand %vm336_vm4, %vm212_vm0  ;;  %vm343_vm11 = vcmp.lt.f32.partialorder %v332_v10, %v334_v11  ;;  %vm346_vm12 = vcmp.ge.f32.partialorder %v332_v10, 0.00392 }
 0x16b   : > { %vm347_vm13 = vmand %vm341_vm5, %vm344_vm6 }
 0x16c   : > { %vm348_vm14 = vmand %vm342_vm8, %vm345_vm9  ;;  %v350_v13 = vsel %vm347_vm13, 75.0, %v762_v8 }
 0x16d   : > { %vm349_vm15 = vmand %vm343_vm11, %vm346_vm12  ;;  %v351_v14 = vsel %vm348_vm14, 75.0, %v762_v8  ;;  %v353_v15 = vsel %vm879_vm7, 255.0, %v350_v13  }
 0x16e   : > { %v352_v16 = vsel %vm349_vm15, 75.0, %v762_v8   ;;  %v354_v17 = vsel %vm339_vm10, 255.0, %v351_v14  }
 0x16f LB: >> { %vm368_vm0 = vcmp.eq.f32.partialorder %v759_v15, 255.0  ;;  %vm369_vm1 = vcmp.eq.f32.partialorder %v755_v17, 255.0  ;;  %v766_v2 = vmov 0.0   ;;  %s767_s7 = smov 1   ;;  %s768_s8 = smov 127   ;;  %vm370_vm4 = vcmp.eq.f32.partialorder %v751_v16, 255.0  ;;  %v759_v15 = vphi %v353_v15, %v945_v15   ;;  %v755_v17 = vphi %v354_v17, %v944_v17   ;;  %v751_v16 = vphi %v352_v16, %v943_v16  }
 0x170   : >> { %v371_v18 = vsel %vm368_vm0, 1.0, %v766_v2  ;;  %v372_v19 = vsel %vm369_vm1, 1.0, %v766_v2  ;;  %v373_v21 = vsel %vm370_vm4, 1.0, %v766_v2  ;;  %vm365_vm5 = vcmp.eq.f32.partialorder %v759_v15, 75.0 }
 0x171   : >> { %v681_v20 = vpack.i.bf16 %v372_v19, %v371_v18  ;;  %vm366_vm6 = vcmp.eq.f32.partialorder %v755_v17, 75.0  ;;  %vm367_vm7 = vcmp.eq.f32.partialorder %v751_v16, 75.0 }
 0x173   : >> { %682 = vrot.lane.b32.xlu1 %v681_v20, %s767_s7  ;;  %677 = vrot.lane.b32.xlu0 %v681_v20, %s768_s8 }
 0x17b   : >> { %384 = vrot.lane.b32.xlu1 %v373_v21, %s767_s7  ;;  %378 = vrot.lane.b32.xlu0 %v373_v21, %s768_s8 }
 0x1e5   : >> { %v683_v22 = vpop.permute.xlu1 %682  ;;  %v678_v23 = vpop.permute.xlu0 %677 }
 0x1e6   : >> { %v685_v24 = vunpack.i.h.bf16 %v683_v22  ;;  %v684_v25 = vunpack.i.l.bf16 %v683_v22  ;;  %v680_v26 = vunpack.i.h.bf16 %v678_v23  ;;  %v679_v27 = vunpack.i.l.bf16 %v678_v23 }
 0x1e8   : >> { %v387_v28 = vmax.f32 %v680_v26, %v685_v24  ;;  %v386_v29 = vmax.f32 %v679_v27, %v684_v25 }
 0x1ea   : >> { %v390_v30 = vmax.f32 %v372_v19, %v387_v28  ;;  %v389_v31 = vmax.f32 %v371_v18, %v386_v29 }
 0x1ec   : >> { %v393_v35 = vrot.slane %v390_v30, 1  ;;  %v399_v36 = vrot.slane %v389_v31, 7  ;;  %v392_v37 = vrot.slane %v389_v31, 1  ;;  %v400_v38 = vrot.slane %v390_v30, 7 }
 0x1ed   : >> { %v385_v32 = vpop.permute.xlu1 %384  ;;  %v379_v33 = vpop.permute.xlu0 %378 }
 0x1ee   : >> { %v388_v34 = vmax.f32 %v379_v33, %v385_v32  ;;  %v397_v42 = vsel %vm281_vm2, %v392_v37, %v393_v35  ;;  %v404_v43 = vsel %vm288_vm3, %v399_v36, %v400_v38 }
 0x1f0   : >> { %v391_v39 = vmax.f32 %v373_v21, %v388_v34 }
 0x1f2   : >> { %v394_v40 = vrot.slane %v391_v39, 1  ;;  %v401_v41 = vrot.slane %v391_v39, 7 }
 0x1f4   : >> { %v396_v44 = vsel %vm281_vm2, %v393_v35, %v394_v40  ;;  %v398_v45 = vsel %vm281_vm2, %v394_v40, %v392_v37  ;;  %v403_v46 = vsel %vm288_vm3, %v400_v38, %v401_v41  ;;  %v405_v47 = vsel %vm288_vm3, %v401_v41, %v399_v36 }
 0x1f5   : >> { %v406_v48 = vmax.f32 %v397_v42, %v405_v47  ;;  %v407_v49 = vmax.f32 %v396_v44, %v404_v43  ;;  %v408_v50 = vmax.f32 %v398_v45, %v403_v46 }
 0x1f7   : >> { %v409_v51 = vmax.f32 %v389_v31, %v406_v48  ;;  %v410_v52 = vmax.f32 %v390_v30, %v407_v49  ;;  %v411_v53 = vmax.f32 %v391_v39, %v408_v50 }
 0x1f9   : >> { %vm412_vm8 = vcmp.gt.f32.partialorder %v409_v51, 0.0  ;;  %vm413_vm9 = vcmp.gt.f32.partialorder %v410_v52, 0.0  ;;  %vm414_vm10 = vcmp.gt.f32.partialorder %v411_v53, 0.0 }
 0x1fa   : >> { %vm415_vm11 = vmand %vm365_vm5, %vm412_vm8 }
 0x1fb   : >> { %vm416_vm12 = vmand %vm366_vm6, %vm413_vm9  ;;  %v418_v54 = vsel %vm415_vm11, 255.0, %v759_v15   ;;  %v580_v55 = vsel %vm415_vm11, 1.0, %v766_v2 }
 0x1fc   : >> { %vm417_vm13 = vmand %vm367_vm7, %vm414_vm10  ;;  %v419_v56 = vsel %vm416_vm12, 255.0, %v755_v17   ;;  %v581_v57 = vsel %vm416_vm12, 1.0, %v766_v2  ;;  %v945_v15 = vmov %v418_v54 }
 0x1fd   : >> { %v427_v58 = vmax.f32 %v580_v55, %v581_v57  ;;  %v420_v59 = vsel %vm417_vm13, 255.0, %v751_v16   ;;  %v582_v60 = vsel %vm417_vm13, 1.0, %v766_v2  ;;  %v944_v17 = vmov %v419_v56 }
 0x1fe   : >> { %v943_v16 = vmov %v420_v59 }
 0x1ff   : >> { %v428_v61 = vmax.f32 %v427_v58, %v582_v60 }
 0x201   : >> { %429 = vmax.xlane.f32.xlu2 %v428_v61 }
 0x274   : >> { %v430_v62 = vpop.xlane.xlu2 %429 }
 0x275   : >> { %v431_v63 = vrot.slane %v430_v62, 4 }
 0x277   : >> { %v432_v0 = vmax.f32 %v430_v62, %v431_v63 }
 0x279   : >> { %v433_v3 = vrot.slane %v432_v0, 2 }
 0x27b   : >> { %v434_v7 = vmax.f32 %v432_v0, %v433_v3 }
 0x27d   : >> { %v435_v9 = vrot.slane %v434_v7, 1 }
 0x27f   : >> { %v436_v10 = vmax.f32 %v434_v7, %v435_v9 }
 0x281   : >> { %588 = vpush %v436_v10 }
 0x2b2   : >> { %s589_s9 = spop %588 }
 0x2b3   : >> { %p361_p8 = scmp.gt.f32.partialorder %s589_s9, 0.0 }
 0x2b5   : > { %364 = sbr.rel (%p361_p8) target bundleno = 367 (0x16f), region = 95 }
 0x2ba   : > { %vm438_vm14 = vcmp.eq.f32.partialorder %v418_v54, 255.0  ;;  %vm439_vm15 = vcmp.eq.f32.partialorder %v419_v56, 255.0  ;;  %vm440_vm0 = vcmp.eq.f32.partialorder %v420_v59, 255.0 }
 0x2bb   : > { %v441_v11 = vsel %vm438_vm14, 255.0, %v762_v8  ;;  %v442_v12 = vsel %vm439_vm15, 255.0, %v762_v8  ;;  %v443_v13 = vsel %vm440_vm0, 255.0, %v762_v8 }
 0x2bc   : > { %v444_v14 = vsub.f32 %v441_v11, %v866_v4  ;;  %v445_v15 = vsub.f32 %v442_v12, %v869_v5  ;;  %v446_v2 = vsub.f32 %v443_v13, %v872_v6 }
 0x2be   : > { %v447_v18 = vmul.f32 %v444_v14, %v444_v14  ;;  %v448_v19 = vmul.f32 %v445_v15, %v445_v15  ;;  %v449_v20 = vmul.f32 %v446_v2, %v446_v2 }
 0x2c0   : > { %v450_v21 = vadd.f32 %v448_v19, %v447_v18 }
 0x2c2   : > { %v451_v1 = vadd.f32 %v450_v21, %v449_v20 }
 0x2c4   : > { %452 = vadd.xlane.f32.xlu0 %v451_v1 }
 0x337   : > { %v453_v16 = vpop.xlane.xlu0 %452 }
 0x338   : > { %v454_v17 = vrot.slane %v453_v16, 4 }
 0x33a   : > { %v455_v22 = vadd.f32 %v454_v17, %v453_v16 }
 0x33c   : > { %v456_v23 = vrot.slane %v455_v22, 2 }
 0x33e   : > { %v457_v24 = vadd.f32 %v456_v23, %v455_v22 }
 0x340   : > { %v458_v25 = vrot.slane %v457_v24, 1 }
 0x342   : > { %v459_v8 = vadd.f32 %v458_v25, %v457_v24 }
 0x344   : > { %590 = vpush %v459_v8 }
 0x375   : > { %s591_s10 = spop %590 }
 0x376   : > { %v461_v4 = vstv %s591_s10 }
 0x377   : > { %462 = vst [vmem:[%s807_s23] sm:$0xff] %v461_v4 }
 0x378 PF: > { %s14_s12 = sadd.s32 1, %s735_s12  }
 0x379   : > { %p11_p9 = scmp.ge.s32.totalorder %s14_s12, 4  }
 0x37b   :  { %13 = sbr.rel (!%p11_p9) target bundleno = 1 (0x1), region = 106 }
 0x380   :  { %482 = vsyncpa [#allocation3], 1 }
 0x381   :  { %484 = vsyncpa [#allocation3 + $0x1], 1 }

// kernel: gradient_difference_loss_canny.3
= control target key start
LH: loop header
LB: loop body
LE: loop exit
PB: predicated region body
PF: predicated region fallthrough
CT: control target
= control target key end

     0   :  { %s688_s9 = smov 0   ;;  %s898_s0 = inlined_call_operand.vmem [shape: f32[2,24,128], index: 0, kind: input, shape index: {}]   ;;  %s899_s1 = inlined_call_operand.vmem [shape: f32[2,24,128], index: 1, kind: output, shape index: {0}]   ;;  %s900_s2 = inlined_call_operand.vmem [shape: f32[2,8,128], index: 2, kind: output, shape index: {1}]  }
   0x1 LB: > { %s624_s10 = sadd.s32 4294967295, %s665_s9   ;;  %p628_p0 = scmp.ge.s32.totalorder %s665_s9, 1  ;;  %s665_s9 = sphi %s688_s9, %s13_s9  }
   0x2   : > { %p115_p1 = scmp.lt.s32.totalorder %s665_s9, 3 }
   0x4   : > { %p116_p2 = pnand %p628_p0, %p115_p1 }
   0x5   : > { %p141_p3 = scmp.lt.s32.totalorder (!%p116_p2), %s624_s10, 1  ;;  %s667_s15 = smov (!%p116_p2), 2  }
   0x6   : > { %119 = sbr.rel (%p116_p2) target bundleno = 897 (0x381), region = 24  ;;  %s668_s16 = smov (!%p116_p2), 1  }
   0x7   : > { %s669_s17 = smov (!%p116_p2), 127   ;;  %s670_s18 = smov (!%p116_p2), 126  }
   0xb   : > { %s920_s10 = smov (!%p141_p3, %s624_s10), 1  ;;  %v158_v24 = vlaneseq }
   0xc   : > { %s634_s11 = smul.u32 24, %s920_s10  ;;  %s631_s23 = sshll.u32 %s920_s10, 3 }
   0xd   : > { %v710_v31 = vshrl.u32 %v158_v24, 7  ;;  %v722_v62 = vand.u32 127, %v158_v24  ;;  %s154_s26 = scalar_lea.vmem %s900_s2, %s631_s23 }
   0xe   : > { %s145_s14 = scalar_lea.vmem %s898_s0, %s634_s11  ;;  %s863_s22 = scalar_lea.vmem %s899_s1, %s634_s11 }
   0xf   : > { %v157_v0 = vld [vmem:[%s145_s14 + $0x10] sm:$0xff]  ;;  %v155_v1 = vld [vmem:[%s145_s14] sm:$0xff]  ;;  %v156_v2 = vld [vmem:[%s145_s14 + $0x8] sm:$0xff]  ;;  %vm222_vm0 = vcmp.lt.s32.totalorder %v710_v31, 2  ;;  %vm232_vm1 = vcmp.lt.s32.totalorder %v710_v31, 1  ;;  %vm248_vm2 = vcmp.lt.s32.totalorder %v710_v31, 7 }
  0x10   : > { %175 = vrot.lane.b32.xlu1 %v157_v0, %s667_s15  ;;  %171 = vrot.lane.b32.xlu0 %v155_v1, %s667_s15  ;;  %vm261_vm3 = vcmp.lt.s32.totalorder %v710_v31, 6  ;;  %vm167_vm4 = vcmp.lt.s32.totalorder %v722_v62, 16 }
  0x11   : > { %182 = vrot.lane.b32.xlu2 %v156_v2, %s668_s16 }
  0x18   : > { %180 = vrot.lane.b32.xlu1 %v155_v1, %s668_s16  ;;  %173 = vrot.lane.b32.xlu0 %v156_v2, %s667_s15 }
  0x19   : > { %184 = vrot.lane.b32.xlu2 %v157_v0, %s668_s16 }
  0x20   : > { %197 = vrot.lane.b32.xlu1 %v156_v2, %s669_s17  ;;  %195 = vrot.lane.b32.xlu0 %v155_v1, %s669_s17 }
  0x21   : > { %199 = vrot.lane.b32.xlu2 %v157_v0, %s669_s17 }
  0x28   : > { %209 = vrot.lane.b32.xlu1 %v156_v2, %s670_s18  ;;  %207 = vrot.lane.b32.xlu0 %v155_v1, %s670_s18 }
  0x29   : > { %211 = vrot.lane.b32.xlu2 %v157_v0, %s670_s18 }
  0x6b   : > { %v183_v3 = vpop.permute.xlu2 %182 }
  0x6c   : > { %v187_v19 = vmul.f32 0.60653067, %v183_v3 }
  0x73   : > { %v185_v4 = vpop.permute.xlu2 %184 }
  0x74   : > { %v188_v8 = vmul.f32 0.60653067, %v185_v4 }
  0x7b   : > { %v200_v7 = vpop.permute.xlu2 %199 }
  0x7c   : > { %v203_v15 = vmul.f32 0.60653067, %v200_v7 }
  0x82   : > { %v176_v5 = vpop.permute.xlu1 %175  ;;  %v172_v6 = vpop.permute.xlu0 %171 }
  0x83   : > { %v179_v9 = vmul.f32 0.13533528, %v176_v5  ;;  %v177_v20 = vmul.f32 0.13533528, %v172_v6  ;;  %v212_v21 = vpop.permute.xlu2 %211 }
  0x84   : > { %v215_v26 = vmul.f32 0.13533528, %v212_v21 }
  0x85   : > { %v191_v12 = vadd.f32 %v188_v8, %v179_v9 }
  0x87   : > { %v194_v16 = vadd.f32 %v191_v12, %v157_v0 }
  0x89   : > { %v206_v25 = vadd.f32 %v203_v15, %v194_v16  ;;  %v671_v16 = vmov 0.0  }
  0x8a   : > { %v181_v10 = vpop.permute.xlu1 %180  ;;  %v174_v11 = vpop.permute.xlu0 %173 }
  0x8b   : > { %v186_v13 = vmul.f32 0.60653067, %v181_v10  ;;  %v178_v14 = vmul.f32 0.13533528, %v174_v11  ;;  %v218_v32 = vadd.f32 %v215_v26, %v206_v25 }
  0x8d   : > { %v189_v22 = vadd.f32 %v186_v13, %v177_v20  ;;  %v190_v23 = vadd.f32 %v187_v19, %v178_v14  ;;  %v221_v41 = vrot.slane %v218_v32, 6  ;;  %v231_v42 = vrot.slane %v218_v32, 7 }
  0x8e   : > { %v247_v57 = vrot.slane %v218_v32, 1 }
  0x8f   : > { %v193_v29 = vadd.f32 %v190_v23, %v156_v2  ;;  %v192_v30 = vadd.f32 %v189_v22, %v155_v1  ;;  %v260_v1 = vrot.slane %v218_v32, 2 }
  0x92   : > { %v198_v17 = vpop.permute.xlu1 %197  ;;  %v196_v18 = vpop.permute.xlu0 %195 }
  0x93   : > { %v202_v27 = vmul.f32 0.60653067, %v198_v17  ;;  %v201_v28 = vmul.f32 0.60653067, %v196_v18 }
  0x95   : > { %v205_v35 = vadd.f32 %v202_v27, %v193_v29  ;;  %v204_v36 = vadd.f32 %v201_v28, %v192_v30 }
  0x9a   : > { %v210_v33 = vpop.permute.xlu1 %209  ;;  %v208_v34 = vpop.permute.xlu0 %207 }
  0x9b   : > { %v214_v37 = vmul.f32 0.13533528, %v210_v33  ;;  %v213_v38 = vmul.f32 0.13533528, %v208_v34 }
  0x9d   : > { %v217_v39 = vadd.f32 %v214_v37, %v205_v35  ;;  %v216_v40 = vadd.f32 %v213_v38, %v204_v36 }
  0x9f   : > { %v220_v43 = vrot.slane %v217_v39, 6  ;;  %v230_v44 = vrot.slane %v217_v39, 7  ;;  %v219_v45 = vrot.slane %v216_v40, 6  ;;  %v229_v46 = vrot.slane %v216_v40, 7 }
  0xa0   : > { %v245_v47 = vrot.slane %v216_v40, 1  ;;  %v246_v48 = vrot.slane %v217_v39, 1  ;;  %v258_v49 = vrot.slane %v216_v40, 2  ;;  %v259_v50 = vrot.slane %v217_v39, 2 }
  0xa1   : > { %v225_v51 = vsel %vm222_vm0, %v221_v41, %v219_v45  ;;  %v235_v52 = vsel %vm232_vm1, %v231_v42, %v229_v46  ;;  %v224_v53 = vsel %vm222_vm0, %v219_v45, %v220_v43  ;;  %v234_v54 = vsel %vm232_vm1, %v229_v46, %v230_v44 }
  0xa2   : > { %v226_v55 = vmul.f32 0.13533528, %v225_v51  ;;  %v236_v56 = vmul.f32 0.60653067, %v235_v52  ;;  %v250_v58 = vsel %vm248_vm2, %v245_v47, %v246_v48  ;;  %v227_v59 = vmul.f32 0.13533528, %v224_v53 }
  0xa3   : > { %v237_v61 = vmul.f32 0.60653067, %v234_v54  ;;  %v263_v63 = vsel %vm261_vm3, %v258_v49, %v259_v50  ;;  %v249_v0 = vsel %vm248_vm2, %v246_v48, %v247_v57  ;;  %v252_v3 = vmul.f32 0.60653067, %v250_v58 }
  0xa4   : > { %v239_v60 = vadd.f32 %v236_v56, %v226_v55  ;;  %v262_v5 = vsel %vm261_vm3, %v259_v50, %v260_v1  ;;  %v265_v7 = vmul.f32 0.13533528, %v263_v63  ;;  %v253_v9 = vmul.f32 0.60653067, %v249_v0 }
  0xa5   : > { %v240_v4 = vadd.f32 %v237_v61, %v227_v59  ;;  %v266_v12 = vmul.f32 0.13533528, %v262_v5 }
  0xa6   : > { %v242_v2 = vadd.f32 %v239_v60, %v216_v40 }
  0xa7   : > { %v243_v8 = vadd.f32 %v240_v4, %v217_v39 }
  0xa8   : > { %v255_v6 = vadd.f32 %v252_v3, %v242_v2 }
  0xa9   : > { %v256_v11 = vadd.f32 %v253_v9, %v243_v8 }
  0xaa   : > { %v268_v10 = vadd.f32 %v265_v7, %v255_v6 }
  0xab   : > { %v269_v14 = vadd.f32 %v266_v12, %v256_v11 }
  0xac   : > { %v271_v13 = vsel %vm167_vm4, %v268_v10, 0.0 }
  0xad   : > { %280 = vrot.lane.b32.xlu2 %v271_v13, %s669_s17  ;;  %274 = vrot.lane.b32.xlu0 %v271_v13, %s668_s16  ;;  %v272_v15 = vsel %vm167_vm4, %v269_v14, 0.0  ;;  %v313_v18 = vmul.f32 2.0, %v271_v13 }
  0xae   : > { %276 = vrot.lane.b32.xlu1 %v272_v15, %s668_s16  ;;  %v314_v22 = vmul.f32 2.0, %v272_v15 }
  0xb5   : > { %282 = vrot.lane.b32.xlu0 %v272_v15, %s669_s17  ;;  %278 = vrot.lane.b32.xlu2 %v671_v16, %s668_s16 }
  0xb6   : > { %284 = vrot.lane.b32.xlu1 %v671_v16, %s669_s17 }
 0x107   : > { %v281_v19 = vpop.permute.xlu2 %280 }
 0x108   : > { %v286_v23 = vmul.f32 -1.0, %v281_v19 }
 0x10f   : > { %v279_v28 = vpop.permute.xlu2 %278 }
 0x11f   : > { %v275_v17 = vpop.permute.xlu0 %274 }
 0x120   : > { %v316_v20 = vadd.f32 %v313_v18, %v275_v17  ;;  %v277_v21 = vpop.permute.xlu1 %276  ;;  %v289_v26 = vadd.f32 %v286_v23, %v275_v17 }
 0x121   : > { %v317_v25 = vadd.f32 %v314_v22, %v277_v21 }
 0x122   : > { %v319_v24 = vadd.f32 %v316_v20, %v281_v19  ;;  %v292_v38 = vrot.slane %v289_v26, 7  ;;  %v298_v49 = vmul.f32 2.0, %v289_v26  ;;  %v304_v50 = vrot.slane %v289_v26, 1 }
 0x124   : > { %v322_v32 = vrot.slane %v319_v24, 7  ;;  %v328_v39 = vrot.slane %v319_v24, 1 }
 0x127   : > { %v283_v27 = vpop.permute.xlu0 %282 }
 0x128   : > { %v287_v29 = vmul.f32 -1.0, %v283_v27  ;;  %v320_v30 = vadd.f32 %v317_v25, %v283_v27  ;;  %v285_v33 = vpop.permute.xlu1 %284 }
 0x129   : > { %v288_v37 = vmul.f32 -1.0, %v285_v33  ;;  %v321_v40 = vadd.f32 %v285_v33, %v279_v28 }
 0x12a   : > { %v290_v34 = vadd.f32 %v287_v29, %v277_v21  ;;  %v323_v35 = vrot.slane %v320_v30, 7  ;;  %v329_v36 = vrot.slane %v320_v30, 1 }
 0x12b   : > { %v291_v46 = vadd.f32 %v288_v37, %v279_v28  ;;  %v324_v47 = vrot.slane %v321_v40, 7  ;;  %v330_v48 = vrot.slane %v321_v40, 1 }
 0x12c   : > { %v293_v41 = vrot.slane %v290_v34, 7  ;;  %v299_v42 = vmul.f32 2.0, %v290_v34  ;;  %v305_v43 = vrot.slane %v290_v34, 1  ;;  %v326_v44 = vsel %vm232_vm1, %v322_v32, %v323_v35 }
 0x12d   : > { %v332_v45 = vsel %vm248_vm2, %v328_v39, %v329_v36  ;;  %v294_v54 = vrot.slane %v291_v46, 7  ;;  %v300_v55 = vmul.f32 2.0, %v291_v46  ;;  %v306_v56 = vrot.slane %v291_v46, 1 }
 0x12e   : > { %v296_v51 = vsel %vm232_vm1, %v292_v38, %v293_v41  ;;  %v334_v52 = vmul.f32 -1.0, %v332_v45  ;;  %v325_v57 = vsel %vm232_vm1, %v323_v35, %v324_v47  ;;  %v327_v58 = vsel %vm232_vm1, %v324_v47, %v322_v32 }
 0x12f   : > { %v302_v53 = vadd.f32 %v299_v42, %v296_v51  ;;  %v331_v59 = vsel %vm248_vm2, %v329_v36, %v330_v48  ;;  %v333_v60 = vsel %vm248_vm2, %v330_v48, %v328_v39  ;;  %v295_v61 = vsel %vm232_vm1, %v293_v41, %v294_v54 }
 0x130   : > { %v297_v63 = vsel %vm232_vm1, %v294_v54, %v292_v38  ;;  %v307_v0 = vsel %vm248_vm2, %v305_v43, %v306_v56  ;;  %v335_v1 = vmul.f32 -1.0, %v331_v59  ;;  %v303_v3 = vadd.f32 %v300_v55, %v295_v61 }
 0x131   : > { %v301_v2 = vadd.f32 %v298_v49, %v297_v63  ;;  %v311_v4 = vadd.f32 %v307_v0, %v302_v53  ;;  %v336_v5 = vmul.f32 -1.0, %v333_v60  ;;  %v308_v6 = vsel %vm248_vm2, %v304_v50, %v305_v43 }
 0x132   : > { %v337_v7 = vadd.f32 %v334_v52, %v327_v58  ;;  %v338_v8 = vadd.f32 %v335_v1, %v326_v44  ;;  %v309_v9 = vsel %vm248_vm2, %v306_v56, %v304_v50 }
 0x133   : > { %v310_v10 = vadd.f32 %v308_v6, %v301_v2  ;;  %v339_v11 = vadd.f32 %v336_v5, %v325_v57  ;;  %v341_v12 = vmul.f32 %v311_v4, %v311_v4  ;;  %v466_v15 = vand.u32 2147483647, %v311_v4 }
 0x134   : > { %v343_v13 = vmul.f32 %v337_v7, %v337_v7  ;;  %v344_v14 = vmul.f32 %v338_v8, %v338_v8  ;;  %v469_v16 = vand.u32 2147483647, %v338_v8  ;;  %vm484_vm5 = vcmp.gt.f32.partialorder %v338_v8, 0.0 }
 0x135   : > { %v340_v17 = vmul.f32 %v310_v10, %v310_v10  ;;  %vm487_vm6 = vcmp.gt.f32.partialorder %v311_v4, 0.0  ;;  %v468_v18 = vand.u32 2147483647, %v337_v7  ;;  %v465_v22 = vand.u32 2147483647, %v310_v10 }
 0x136   : > { %v347_v19 = vadd.f32 %v344_v14, %v341_v12  ;;  %v478_v20 = vmul.f32 0.41421357, %v469_v16  ;;  %vm761_vm7 = vmxor %vm484_vm5, %vm487_vm6  ;;  %vm486_vm8 = vcmp.gt.f32.partialorder %v310_v10, 0.0  ;;  %vm483_vm9 = vcmp.gt.f32.partialorder %v337_v7, 0.0 }
 0x137   : > { %v346_v23 = vadd.f32 %v343_v13, %v340_v17  ;;  %v477_v24 = vmul.f32 0.41421357, %v468_v18  ;;  %v312_v25 = vadd.f32 %v309_v9, %v303_v3  ;;  %vm765_vm10 = vmxor %vm483_vm9, %vm486_vm8  ;;  %vm485_vm11 = vcmp.gt.f32.partialorder %v339_v11, 0.0 }
 0x138   : > { %653 = vrsqrt.f32 %v347_v19  ;;  %vm769_vm12 = vcmp.le.f32.partialorder %v466_v15, %v478_v20  ;;  %v470_v32 = vand.u32 2147483647, %v339_v11  ;;  %v471_v33 = vmul.f32 0.41421357, %v465_v22 }
 0x139   : > { %655 = vrsqrt.f32 %v346_v23  ;;  %vm773_vm13 = vcmp.le.f32.partialorder %v465_v22, %v477_v24  ;;  %vm488_vm14 = vcmp.gt.f32.partialorder %v312_v25, 0.0  ;;  %v467_v29 = vand.u32 2147483647, %v312_v25 }
 0x13a   : > { %vm777_vm15 = vmxor %vm485_vm11, %vm488_vm14  ;;  %v472_v34 = vmul.f32 0.41421357, %v466_v15  ;;  %vm781_vm0 = vcmp.le.f32.partialorder %v468_v18, %v471_v33  ;;  %v479_v38 = vmul.f32 0.41421357, %v470_v32  ;;  %vm368_vm8 = vcmp.eq.f32.partialorder %v347_v19, inf }
 0x13b   : > { %v473_v35 = vmul.f32 0.41421357, %v467_v29  ;;  %v371_v55 = vand.u32 2147483648, %v347_v19  ;;  %vm356_vm9 = vcmp.eq.f32.partialorder %v346_v23, inf  ;;  %v359_v56 = vand.u32 2147483648, %v346_v23 }
 0x13c   : > { %vm785_vm3 = vcmp.le.f32.partialorder %v469_v16, %v472_v34  ;;  %vm793_vm6 = vcmp.le.f32.partialorder %v467_v29, %v479_v38  ;;  %vm370_vm11 = vcmp.eq.f32.partialorder %v347_v19, 0.0  ;;  %vm358_vm14 = vcmp.eq.f32.partialorder %v346_v23, 0.0 }
 0x13d   : > { %vm789_vm5 = vcmp.le.f32.partialorder %v470_v32, %v473_v35 }
 0x13e   : > { %v654_v39 = vpop.eup %653 }
 0x13f   : > { %v656_v41 = vpop.eup %655  ;;  %v362_v42 = vmul.f32 %v654_v39, %v347_v19 }
 0x140   : > { %v350_v44 = vmul.f32 %v656_v41, %v346_v23 }
 0x141   : > { %v363_v45 = vmul.f32 %v654_v39, %v362_v42 }
 0x142   : > { %v351_v46 = vmul.f32 %v656_v41, %v350_v44 }
 0x143   : > { %v364_v47 = vmul.f32 0.5, %v363_v45 }
 0x144   : > { %v352_v48 = vmul.f32 0.5, %v351_v46 }
 0x145   : > { %v365_v49 = vsub.f32 1.5, %v364_v47 }
 0x146   : > { %v353_v50 = vsub.f32 1.5, %v352_v48 }
 0x147   : > { %v366_v51 = vmul.f32 %v654_v39, %v365_v49 }
 0x148   : > { %v354_v52 = vmul.f32 %v656_v41, %v353_v50 }
 0x149   : > { %v367_v53 = vmul.f32 %v366_v51, %v347_v19 }
 0x14a   : > { %v355_v54 = vmul.f32 %v354_v52, %v346_v23 }
 0x14b   : > { %v369_v57 = vsel %vm368_vm8, %v347_v19, %v367_v53 }
 0x14c   : > { %v357_v58 = vsel %vm356_vm9, %v346_v23, %v355_v54  ;;  %v372_v59 = vsel %vm370_vm11, %v371_v55, %v369_v57 }
 0x14d   : > { %v360_v60 = vsel %vm358_vm14, %v359_v56, %v357_v58  ;;  %v386_v61 = vsel %vm167_vm4, %v372_v59, 0.0 }
 0x14e   : > { %v385_v63 = vsel %vm167_vm4, %v360_v60, 0.0 }
 0x14f   : > { %v388_v0 = vmax.f32 %v385_v63, %v386_v61 }
 0x151   : > { %v389_v1 = vmax.f32 %v388_v0, 0.0 }
 0x153   : > { %390 = vmax.xlane.f32.xlu0 %v389_v1 }
 0x1c6   : > { %v391_v2 = vpop.xlane.xlu0 %390 }
 0x1c7   : > { %v392_v3 = vrot.slane %v391_v2, 4 }
 0x1c9   : > { %v393_v4 = vmax.f32 %v391_v2, %v392_v3 }
 0x1cb   : > { %v394_v5 = vrot.slane %v393_v4, 2 }
 0x1cd   : > { %v395_v6 = vmax.f32 %v393_v4, %v394_v5 }
 0x1cf   : > { %v396_v7 = vrot.slane %v395_v6, 1 }
 0x1d1   : > { %v397_v8 = vmax.f32 %v395_v6, %v396_v7 }
 0x1d3   : > { %635 = vpush %v397_v8 }
 0x204   : > { %s636_s19 = spop %635 }
 0x205   : > { %v399_v9 = vstv %s636_s19 }
 0x206   : > { %657 = vrcp.f32 %v399_v9  ;;  %v411_v13 = vand.u32 2147483648, %v399_v9  ;;  %v409_v14 = vand.u32 2147483647, %v399_v9  ;;  %vm405_vm8 = vweird.f32 %v399_v9 }
 0x208   : > { %v412_v16 = vor.u32 1.1754944e-38, %v411_v13  ;;  %vm410_vm11 = vcmp.eq.f32.partialorder %v409_v14, 8.507059e+37 }
 0x20c   : > { %v658_v10 = vpop.eup %657 }
 0x20d   : > { %v401_v11 = vmul.f32 %v658_v10, %v399_v9  ;;  %vm406_vm4 = vweird.f32 %v658_v10 }
 0x20e   : > { %vm407_vm9 = vmor %vm405_vm8, %vm406_vm4 }
 0x20f   : > { %v402_v12 = vsub.f32 1.0, %v401_v11 }
 0x211   : > { %v403_v62 = vmul.f32 %v658_v10, %v402_v12 }
 0x213   : > { %v404_v15 = vadd.f32 %v658_v10, %v403_v62 }
 0x215   : > { %v408_v17 = vsel %vm407_vm9, %v658_v10, %v404_v15 }
 0x216   : > { %v413_v18 = vsel %vm410_vm11, %v412_v16, %v408_v17 }
 0x217   : > { %v801_v19 = vmul.f32 %v413_v18, %v385_v63  ;;  %v415_v20 = vmul.f32 %v413_v18, %v386_v61  ;;  %v803_v22 = vmul.f32 0.0, %v413_v18 }
 0x219   : > { %431 = vrot.lane.b32.xlu2 %v415_v20, %s669_s17  ;;  %429 = vrot.lane.b32.xlu1 %v801_v19, %s669_s17  ;;  %v417_v23 = vrot.slane %v801_v19, 1  ;;  %v419_v24 = vrot.slane %v803_v22, 1  ;;  %v418_v25 = vrot.slane %v415_v20, 1  ;;  %v423_v29 = vrot.slane %v801_v19, 7 }
 0x21a   : > { %v424_v32 = vrot.slane %v415_v20, 7  ;;  %v425_v33 = vrot.slane %v803_v22, 7 }
 0x21b   : > { %v814_v34 = vsel %vm248_vm2, %v419_v24, %v417_v23  ;;  %v420_v35 = vsel %vm248_vm2, %v418_v25, %v419_v24  ;;  %v421_v38 = vsel %vm248_vm2, %v417_v23, %v418_v25 }
 0x21c   : > { %445 = vrot.lane.b32.xlu0 %v814_v34, %s669_s17  ;;  %v427_v39 = vsel %vm232_vm1, %v423_v29, %v424_v32  ;;  %v428_v41 = vsel %vm232_vm1, %v425_v33, %v423_v29  ;;  %v828_v42 = vsel %vm232_vm1, %v424_v32, %v425_v33  ;;  %vm672_vm1 = vmmov 1  }
 0x21d   : > { %v499_v44 = vmax.f32 %v420_v35, %v427_v39  ;;  %v498_v45 = vmax.f32 %v421_v38, %v428_v41  ;;  %v500_v46 = vmax.f32 %v814_v34, %v828_v42  ;;  %vm493_vm2 = vmxor %vm761_vm7, %vm672_vm1 }
 0x21e   : > { %vm492_vm7 = vmxor %vm765_vm10, %vm672_vm1 }
 0x21f   : > { %vm494_vm10 = vmxor %vm777_vm15, %vm672_vm1 }
 0x221   : > { %437 = vrot.lane.b32.xlu2 %v415_v20, %s668_s16  ;;  %435 = vrot.lane.b32.xlu1 %v801_v19, %s668_s16 }
 0x224   : > { %439 = vrot.lane.b32.xlu0 %v803_v22, %s668_s16 }
 0x229   : > { %443 = vrot.lane.b32.xlu2 %v420_v35, %s669_s17  ;;  %441 = vrot.lane.b32.xlu1 %v421_v38, %s669_s17 }
 0x231   : > { %449 = vrot.lane.b32.xlu2 %v420_v35, %s668_s16  ;;  %447 = vrot.lane.b32.xlu1 %v421_v38, %s668_s16 }
 0x239   : > { %455 = vrot.lane.b32.xlu2 %v427_v39, %s669_s17  ;;  %453 = vrot.lane.b32.xlu1 %v428_v41, %s669_s17 }
 0x241   : > { %461 = vrot.lane.b32.xlu2 %v427_v39, %s668_s16  ;;  %459 = vrot.lane.b32.xlu1 %v428_v41, %s668_s16 }
 0x249   : > { %457 = vrot.lane.b32.xlu2 %v828_v42, %s669_s17  ;;  %451 = vrot.lane.b32.xlu1 %v814_v34, %s668_s16 }
 0x251   : > { %433 = vrot.lane.b32.xlu2 %v803_v22, %s669_s17  ;;  %463 = vrot.lane.b32.xlu1 %v828_v42, %s668_s16 }
 0x273   : > { %v432_v31 = vpop.permute.xlu2 %431 }
 0x27b   : > { %v438_v47 = vpop.permute.xlu2 %437 }
 0x27c   : > { %v496_v57 = vmax.f32 %v432_v31, %v438_v47 }
 0x283   : > { %v444_v48 = vpop.permute.xlu2 %443 }
 0x28b   : > { %v450_v49 = vpop.permute.xlu2 %449  ;;  %v430_v50 = vpop.permute.xlu1 %429 }
 0x28e   : > { %v446_v7 = vpop.permute.xlu0 %445 }
 0x293   : > { %v436_v51 = vpop.permute.xlu1 %435  ;;  %v456_v52 = vpop.permute.xlu2 %455 }
 0x294   : > { %v505_v55 = vmax.f32 %v450_v49, %v456_v52  ;;  %v495_v2 = vmax.f32 %v430_v50, %v436_v51 }
 0x296   : > { %v440_v13 = vpop.permute.xlu0 %439 }
 0x29b   : > { %v462_v53 = vpop.permute.xlu2 %461  ;;  %v442_v54 = vpop.permute.xlu1 %441 }
 0x29c   : > { %v502_v56 = vmax.f32 %v444_v48, %v462_v53 }
 0x29e   : > { %v508_v58 = vsel %vm493_vm2, %v502_v56, %v505_v55 }
 0x29f   : > { %v511_v59 = vsel %vm769_vm12, %v499_v44, %v508_v58 }
 0x2a0   : > { %v514_v60 = vsel %vm785_vm3, %v496_v57, %v511_v59 }
 0x2a1   : > { %vm517_vm14 = vcmp.gt.f32.partialorder %v415_v20, %v514_v60 }
 0x2a2   : > { %v520_v61 = vsel %vm517_vm14, %v415_v20, 0.0 }
 0x2a3   : > { %v448_v63 = vpop.permute.xlu1 %447  ;;  %523 = vst [vmem:[%s863_s22 + $0x8] sm:$0xff] %v520_v61  ;;  %v458_v5 = vpop.permute.xlu2 %457 }
 0x2ab   : > { %v454_v21 = vpop.permute.xlu1 %453  ;;  %v434_v26 = vpop.permute.xlu2 %433 }
 0x2ac   : > { %v504_v1 = vmax.f32 %v448_v63, %v454_v21  ;;  %v497_v28 = vmax.f32 %v434_v26, %v440_v13 }
 0x2b3   : > { %v460_v0 = vpop.permute.xlu1 %459 }
 0x2b4   : > { %v501_v27 = vmax.f32 %v442_v54, %v460_v0 }
 0x2b6   : > { %v507_v3 = vsel %vm492_vm7, %v501_v27, %v504_v1 }
 0x2b7   : > { %v510_v37 = vsel %vm773_vm13, %v498_v45, %v507_v3 }
 0x2b8   : > { %v513_v4 = vsel %vm781_vm0, %v495_v2, %v510_v37 }
 0x2b9   : > { %vm516_vm12 = vcmp.gt.f32.partialorder %v801_v19, %v513_v4 }
 0x2ba   : > { %v519_v6 = vsel %vm516_vm12, %v801_v19, 0.0 }
 0x2bb   : > { %v452_v8 = vpop.permute.xlu1 %451  ;;  %522 = vst [vmem:[%s863_s22] sm:$0xff] %v519_v6  ;;  %v525_v9 = vmax.f32 %v519_v6, %v520_v61 }
 0x2bc   : > { %v506_v11 = vmax.f32 %v452_v8, %v458_v5 }
 0x2c3   : > { %v464_v10 = vpop.permute.xlu1 %463 }
 0x2c4   : > { %v503_v12 = vmax.f32 %v446_v7, %v464_v10 }
 0x2c6   : > { %v509_v36 = vsel %vm494_vm10, %v503_v12, %v506_v11 }
 0x2c7   : > { %v512_v62 = vsel %vm793_vm6, %v500_v46, %v509_v36 }
 0x2c8   : > { %v515_v14 = vsel %vm789_vm5, %v497_v28, %v512_v62 }
 0x2c9   : > { %vm518_vm13 = vcmp.gt.f32.partialorder %v803_v22, %v515_v14 }
 0x2ca   : > { %v521_v15 = vsel %vm518_vm13, %v803_v22, 0.0 }
 0x2cb   : > { %v526_v16 = vmax.f32 %v525_v9, %v521_v15  ;;  %524 = vst [vmem:[%s863_s22 + $0x10] sm:$0xff] %v521_v15 }
 0x2cd   : > { %527 = vmax.xlane.f32.xlu1 %v526_v16 }
 0x340   : > { %v528_v30 = vpop.xlane.xlu1 %527 }
 0x341   : > { %v529_v17 = vrot.slane %v528_v30, 4 }
 0x343   : > { %v530_v18 = vmax.f32 %v528_v30, %v529_v17 }
 0x345   : > { %v531_v19 = vrot.slane %v530_v18, 2 }
 0x347   : > { %v532_v20 = vmax.f32 %v530_v18, %v531_v19 }
 0x349   : > { %v533_v23 = vrot.slane %v532_v20, 1 }
 0x34b   : > { %v534_v24 = vmax.f32 %v532_v20, %v533_v23 }
 0x34d   : > { %637 = vpush %v534_v24 }
 0x37e   : > { %s638_s27 = spop %637 }
 0x37f   : > { %v536_v40 = vstv %s638_s27 }
 0x380   : > { %537 = vst [vmem:[%s154_s26] sm:$0xff] %v536_v40 }
 0x381 PF: > { %s13_s9 = sadd.s32 1, %s665_s9  }
 0x382   : > { %p10_p4 = scmp.ge.s32.totalorder %s13_s9, 4  }
 0x384   :  { %12 = sbr.rel (!%p10_p4) target bundleno = 1 (0x1), region = 66 }

</bundles_post_ra>
